<compile_context>
chip_gen: v5e
topology: v5e:2x2
jax: 0.10.0
libtpu: 0.0.40
codegen_flags: <defaults>
</compile_context>

<pallas_src>
import math
import functools

import jax
import jax.numpy as jnp
from jax import lax
from jax.experimental import pallas as pl
from jax.experimental.pallas import tpu as pltpu


def _round_up(x, m):
    return (x + m - 1) // m * m


# ---------------------------------------------------------------------------
# Fused kernel: grid=(num_layers,); in-kernel fori_loop over time.
# ---------------------------------------------------------------------------
def _stacked_gru_kernel(xs_ref, h0_ref, wih0_ref, wihr_ref, whh_ref, bg_ref,
                        bhn_ref, out_ref, hout_ref, seq_ref,
                        *, num_layers, seq_len, h_pad):
    l = pl.program_id(0)
    H = h_pad

    # Small per-layer constants: hoist once (loads are tiny).
    bias = bg_ref[...]        # (1, 3H) f32 : [b_ir+b_hr | b_iz+b_hz | b_in]
    bhn = bhn_ref[...]        # (1, H)  f32 : b_hn

    def run_layer(get_x, wih_ref):
        def step(t, h):
            # Input-to-hidden and hidden-to-hidden GEMMs: bf16 operands,
            # f32 MXU accumulation.
            gi = jnp.dot(get_x(t), wih_ref[...],
                         preferred_element_type=jnp.float32) + bias
            gh = jnp.dot(h.astype(jnp.bfloat16), whh_ref[...],
                         preferred_element_type=jnp.float32)
            r = jax.nn.sigmoid(gi[:, 0:H] + gh[:, 0:H])
            z = jax.nn.sigmoid(gi[:, H:2 * H] + gh[:, H:2 * H])
            n = jnp.tanh(gi[:, 2 * H:3 * H] + r * (gh[:, 2 * H:3 * H] + bhn))
            h_new = (1.0 - z) * n + z * h
            # Next layer's input (inter-layer nn.Dropout is identity in eval
            # mode) stays in VMEM in bf16; out_ref is a VMEM-resident output
            # block, so each layer's write just overwrites the previous one
            # and only the last layer's values are written back to HBM (once).
            seq_ref[t] = h_new.astype(jnp.bfloat16)
            out_ref[t] = h_new
            return h_new

        h_last = lax.fori_loop(0, seq_len, step, h0_ref[...])
        hout_ref[...] = h_last                  # final hidden for this layer

    # Layer 0 consumes the external input sequence (width d_pad); layers >= 1
    # consume the previous layer's bf16 output sequence held in VMEM scratch.
    @pl.when(l == 0)
    def _():
        run_layer(lambda t: xs_ref[t], wih0_ref)

    @pl.when(l > 0)
    def _():
        run_layer(lambda t: seq_ref[t], wihr_ref)


def _stacked_gru_pallas(xs_p, h_p, wih0, wihr, whh, bg, bhn, *,
                        num_layers, seq_len, b_pad, d_pad, h_pad):
    kernel = functools.partial(_stacked_gru_kernel, num_layers=num_layers,
                               seq_len=seq_len, h_pad=h_pad)

    grid_spec = pltpu.PrefetchScalarGridSpec(
        num_scalar_prefetch=0,
        grid=(num_layers,),
        in_specs=[
            # Whole input sequence VMEM-resident (bf16): one DMA per call.
            pl.BlockSpec((seq_len, b_pad, d_pad), lambda l: (0, 0, 0)),
            # Initial hidden of layer l: one DMA per layer.
            pl.BlockSpec((None, b_pad, h_pad), lambda l: (l, 0, 0)),
            # Layer-0 input weights: resident for the whole call.
            pl.BlockSpec((d_pad, 3 * h_pad), lambda l: (0, 0)),
            # Input weights for layers >= 1. Index is clamped at l == 0 to
            # block 0 (layer 1's weights), so the prefetch at layer 0 is the
            # same block layer 1 needs -> total W_ih traffic is exactly L-1
            # blocks here plus the resident layer-0 block above.
            pl.BlockSpec((None, h_pad, 3 * h_pad),
                         lambda l: (jnp.maximum(l - 1, 0), 0, 0)),
            # Hidden-to-hidden weights, one block per layer.
            pl.BlockSpec((None, h_pad, 3 * h_pad), lambda l: (l, 0, 0)),
            # Folded biases [b_ir+b_hr | b_iz+b_hz | b_in], per layer.
            pl.BlockSpec((None, 1, 3 * h_pad), lambda l: (l, 0, 0)),
            # b_hn, per layer.
            pl.BlockSpec((None, 1, h_pad), lambda l: (l, 0, 0)),
        ],
        out_specs=[
            # Last-layer output sequence: VMEM-resident, written back once.
            pl.BlockSpec((seq_len, b_pad, h_pad), lambda l: (0, 0, 0)),
            # Final hidden of layer l: written back once per layer.
            pl.BlockSpec((None, b_pad, h_pad), lambda l: (l, 0, 0)),
        ],
        scratch_shapes=[
            # Previous layer's output sequence (next layer's input), bf16.
            pltpu.VMEM((seq_len, b_pad, h_pad), jnp.bfloat16),
        ],
    )

    # --- VMEM budget: resident slabs + double-buffered per-layer blocks. ---
    bf2, f4 = 2, 4
    vmem_est = (
        seq_len * b_pad * d_pad * bf2            # xs (resident)
        + d_pad * 3 * h_pad * bf2                # wih0 (resident)
        + 2 * h_pad * 3 * h_pad * bf2            # wihr (double-buffered)
        + 2 * h_pad * 3 * h_pad * bf2            # whh  (double-buffered)
        + 2 * b_pad * h_pad * f4                 # h0
        + 2 * (3 * h_pad + h_pad) * f4           # biases
        + seq_len * b_pad * h_pad * f4           # out sequence (resident)
        + 2 * b_pad * h_pad * f4                 # h_1 block
        + seq_len * b_pad * h_pad * bf2          # seq scratch (bf16)
    )
    # Headroom for internal scratch, but never request more than ~48 MiB so
    # the same kernel also fits v7x's 64 MiB VMEM (v5e/v6e have 128 MiB).
    vmem_limit = int(min(max(2 * vmem_est + (4 << 20), 32 << 20), 48 << 20))

    # --- Advisory cost estimate so XLA schedules surrounding decoder ops. ---
    n_rest = max(num_layers - 1, 0)
    flops = 2 * b_pad * 3 * h_pad * seq_len * (d_pad + h_pad
                                               + n_rest * 2 * h_pad)
    transcendentals = 3 * b_pad * h_pad * num_layers * seq_len
    bytes_accessed = (
        (d_pad * 3 * h_pad + n_rest * h_pad * 3 * h_pad
         + num_layers * h_pad * 3 * h_pad) * bf2       # weights
        + num_layers * 4 * h_pad * f4                  # biases
        + seq_len * b_pad * d_pad * bf2                # xs
        + num_layers * b_pad * h_pad * f4              # h0
        + seq_len * b_pad * h_pad * f4                 # out sequence
        + num_layers * b_pad * h_pad * f4)             # h_1

    return pl.pallas_call(
        kernel,
        out_shape=(
            jax.ShapeDtypeStruct((seq_len, b_pad, h_pad), jnp.float32),
            jax.ShapeDtypeStruct((num_layers, b_pad, h_pad), jnp.float32),
        ),
        grid_spec=grid_spec,
        compiler_params=pltpu.CompilerParams(
            dimension_semantics=("arbitrary",),        # layers are sequential
            vmem_limit_bytes=vmem_limit,
        ),
        cost_estimate=pl.CostEstimate(
            flops=int(flops),
            transcendentals=int(transcendentals),
            bytes_accessed=int(bytes_accessed)),
    )(xs_p, h_p, wih0, wihr, whh, bg, bhn)


# ---------------------------------------------------------------------------
# Parameter init (torch.nn.GRUCell reset_parameters), packed into the fused,
# lane-aligned kernel layout.
#
# INVARIANT: all padded rows/lanes (>= input_size / rnn_size) MUST be zero;
# the kernel relies on this so padded lanes of h stay exactly 0 across layers.
# Any external (torch-checkpoint) loader must preserve it.
# ---------------------------------------------------------------------------
def init_stacked_gru_params(key, num_layers, input_size, rnn_size,
                            weight_dtype=jnp.bfloat16):
    h_pad = _round_up(rnn_size, 128)
    d_pad = _round_up(input_size, 128)
    stdv = 1.0 / math.sqrt(rnn_size)

    wih0 = jnp.zeros((d_pad, 3 * h_pad), jnp.float32)
    wihr = jnp.zeros((max(num_layers - 1, 1), h_pad, 3 * h_pad), jnp.float32)
    whh = jnp.zeros((num_layers, h_pad, 3 * h_pad), jnp.float32)
    bg = jnp.zeros((num_layers, 1, 3 * h_pad), jnp.float32)
    bhn = jnp.zeros((num_layers, 1, h_pad), jnp.float32)

    d_in = input_size
    for layer in range(num_layers):
        key, k1, k2, k3, k4 = jax.random.split(key, 5)
        w_ih = jax.random.uniform(k1, (3 * rnn_size, d_in), jnp.float32, -stdv, stdv)
        w_hh = jax.random.uniform(k2, (3 * rnn_size, rnn_size), jnp.float32, -stdv, stdv)
        b_ih = jax.random.uniform(k3, (3 * rnn_size,), jnp.float32, -stdv, stdv)
        b_hh = jax.random.uniform(k4, (3 * rnn_size,), jnp.float32, -stdv, stdv)
        # Each gate occupies its own 128-lane-aligned [g*h_pad, g*h_pad+H) block.
        for g in range(3):
            blk_in = w_ih[g * rnn_size:(g + 1) * rnn_size, :].T   # (d_in, H)
            if layer == 0:
                wih0 = wih0.at[:d_in, g * h_pad:g * h_pad + rnn_size].set(blk_in)
            else:
                wihr = wihr.at[layer - 1, :d_in,
                               g * h_pad:g * h_pad + rnn_size].set(blk_in)
            whh = whh.at[layer, :rnn_size, g * h_pad:g * h_pad + rnn_size].set(
                w_hh[g * rnn_size:(g + 1) * rnn_size, :].T)
        # Fold b_ih + b_hh for r and z; keep b_in in the folded vector and
        # b_hn separate (needed inside the r * (...) term).
        bg = bg.at[layer, 0, 0:rnn_size].set(
            b_ih[0:rnn_size] + b_hh[0:rnn_size])
        bg = bg.at[layer, 0, h_pad:h_pad + rnn_size].set(
            b_ih[rnn_size:2 * rnn_size] + b_hh[rnn_size:2 * rnn_size])
        bg = bg.at[layer, 0, 2 * h_pad:2 * h_pad + rnn_size].set(
            b_ih[2 * rnn_size:3 * rnn_size])
        bhn = bhn.at[layer, 0, 0:rnn_size].set(b_hh[2 * rnn_size:3 * rnn_size])
        d_in = rnn_size

    return {
        "wih0": wih0.astype(weight_dtype),
        "wihr": wihr.astype(weight_dtype),
        "whh": whh.astype(weight_dtype),
        "bg": bg,
        "bhn": bhn,
    }


# ---------------------------------------------------------------------------
# Wrappers.
# ---------------------------------------------------------------------------
@functools.partial(jax.jit, static_argnames=("num_layers",))
def stacked_gru_decode(xs, hidden, params, num_layers):
    """Apply StackedGRU.forward sequentially over T tokens in ONE kernel call.

    xs: (T, B, input_size), hidden: (num_layers, B, rnn_size)
    returns (outputs (T, B, rnn_size), h_T (num_layers, B, rnn_size)).
    """
    wih0, wihr = params["wih0"], params["wihr"]
    whh, bg, bhn = params["whh"], params["bg"], params["bhn"]
    T, B, D = xs.shape
    L, _, H = hidden.shape
    d_pad = wih0.shape[0]
    h_pad = whh.shape[1]
    # 16-row batch granule: bf16 activations then occupy full (16,128) tiles.
    b_pad = _round_up(max(B, 1), 16)

    xs_p = jnp.zeros((T, b_pad, d_pad), jnp.bfloat16).at[:, :B, :D].set(
        xs.astype(jnp.bfloat16))
    h_p = jnp.zeros((L, b_pad, h_pad), jnp.float32).at[:, :B, :H].set(
        hidden.astype(jnp.float32))

    out_p, h1_p = _stacked_gru_pallas(
        xs_p, h_p, wih0, wihr, whh, bg, bhn,
        num_layers=num_layers, seq_len=T,
        b_pad=b_pad, d_pad=d_pad, h_pad=h_pad)

    outs = out_p[:, :B, :H].astype(hidden.dtype)
    h_T = h1_p[:, :B, :H].astype(hidden.dtype)
    return outs, h_T


def stacked_gru_forward(x, hidden, params, num_layers):
    """Exact StackedGRU.forward (single step, eval mode).

    x: (B, input_size), hidden: (num_layers, B, rnn_size)
    returns (output (B, rnn_size), h_1 (num_layers, B, rnn_size))."""
    outs, h_1 = stacked_gru_decode(x[None], hidden, params, num_layers=num_layers)
    return outs[0], h_1


# ---------------------------------------------------------------------------
# Pure-JAX reference (same bf16 weights / bf16 activation rounding / f32 acc).
# ---------------------------------------------------------------------------
def _reference_step(x, hidden, params, num_layers):
    wih0, wihr = params["wih0"], params["wihr"]
    whh, bg, bhn = params["whh"], params["bg"], params["bhn"]
    B, D = x.shape
    _, _, H = hidden.shape
    d_pad = wih0.shape[0]
    h_pad = whh.shape[1]

    xin = jnp.zeros((B, d_pad), jnp.float32).at[:, :D].set(x.astype(jnp.float32))
    h_stack = []
    for i in range(num_layers):
        w_in = wih0 if i == 0 else wihr[i - 1]
        h = jnp.zeros((B, h_pad), jnp.float32).at[:, :H].set(
            hidden[i].astype(jnp.float32))
        gi = jnp.dot(xin.astype(jnp.bfloat16), w_in,
                     preferred_element_type=jnp.float32) + bg[i]
        gh = jnp.dot(h.astype(jnp.bfloat16), whh[i],
                     preferred_element_type=jnp.float32)
        r = jax.nn.sigmoid(gi[:, :h_pad] + gh[:, :h_pad])
        z = jax.nn.sigmoid(gi[:, h_pad:2 * h_pad] + gh[:, h_pad:2 * h_pad])
        n = jnp.tanh(gi[:, 2 * h_pad:] + r * (gh[:, 2 * h_pad:] + bhn[i]))
        h_new = (1.0 - z) * n + z * h
        xin = h_new                       # next layer's input (h_pad wide)
        h_stack.append(h_new[:, :H])
    return h_stack[-1], jnp.stack(h_stack)


def _reference_decode(xs, hidden, params, num_layers):
    outs = []
    h = hidden
    for t in range(xs.shape[0]):
        o, h = _reference_step(xs[t], h, params, num_layers)
        outs.append(o)
    return jnp.stack(outs), h


if __name__ == "__main__":
    num_layers = 3
    batch = 4
    input_size = 32
    rnn_size = 32
    seq_len = 5

    key = jax.random.PRNGKey(0)
    k_params, k_x, k_h = jax.random.split(key, 3)

    params = init_stacked_gru_params(k_params, num_layers, input_size, rnn_size)
    xs = jax.random.normal(k_x, (seq_len, batch, input_size), jnp.float32)
    hidden = jax.random.normal(k_h, (num_layers, batch, rnn_size), jnp.float32)

    # --- Single step: exactly StackedGRU.forward semantics ---
    out, h_1 = stacked_gru_forward(xs[0], hidden, params, num_layers=num_layers)
    out = jax.block_until_ready(out)
    h_1 = jax.block_until_ready(h_1)
    ref_out, ref_h1 = _reference_step(xs[0], hidden, params, num_layers)
    assert out.shape == (batch, rnn_size)
    assert h_1.shape == (num_layers, batch, rnn_size)
    assert jnp.allclose(out, ref_out, atol=5e-3, rtol=5e-3)
    assert jnp.allclose(h_1, ref_h1, atol=5e-3, rtol=5e-3)

    # --- Multi-token decode: time loop hoisted into one kernel call ---
    outs, h_T = stacked_gru_decode(xs, hidden, params, num_layers=num_layers)
    outs = jax.block_until_ready(outs)
    h_T = jax.block_until_ready(h_T)
    ref_outs, ref_hT = _reference_decode(xs, hidden, params, num_layers)
    assert outs.shape == (seq_len, batch, rnn_size)
    assert h_T.shape == (num_layers, batch, rnn_size)
    assert jnp.allclose(outs, ref_outs, atol=5e-3, rtol=5e-3)
    assert jnp.allclose(h_T, ref_hT, atol=5e-3, rtol=5e-3)

    print("KERNEL_OK")
</pallas_src>

<mosaic_0001>
module attributes {stable_mosaic.version = 11 : i64} {
  func.func @_stacked_gru_kernel(%arg0: i32, %arg1: memref<1x16x128xbf16, #tpu.memory_space<vmem>>, %arg2: memref<1x16x128xf32, #tpu.memory_space<vmem>>, %arg3: memref<128x384xbf16, #tpu.memory_space<vmem>>, %arg4: memref<1x128x384xbf16, #tpu.memory_space<vmem>>, %arg5: memref<1x128x384xbf16, #tpu.memory_space<vmem>>, %arg6: memref<1x1x384xf32, #tpu.memory_space<vmem>>, %arg7: memref<1x1x128xf32, #tpu.memory_space<vmem>>, %arg8: memref<1x16x128xf32, #tpu.memory_space<vmem>>, %arg9: memref<1x16x128xf32, #tpu.memory_space<vmem>>, %arg10: memref<1x16x128xbf16, #tpu.memory_space<vmem>>) attributes {dimension_semantics = [#tpu.dimension_semantics<arbitrary>], iteration_bounds = array<i64: 3>, scalar_prefetch = 0 : i64, scratch_operands = 1 : i64, tpu.core_type = #tpu.core_type<tc>, window_params = [{pipeline_mode = #tpu.pipeline_mode<synchronous>, transform_indices = @transform_0, window_bounds = array<i64: 1, 16, 128>}, {transform_indices = @transform_1, window_bounds = array<i64: 1, 16, 128>}, {pipeline_mode = #tpu.pipeline_mode<synchronous>, transform_indices = @transform_2, window_bounds = array<i64: 128, 384>}, {transform_indices = @transform_3, window_bounds = array<i64: 1, 128, 384>}, {transform_indices = @transform_4, window_bounds = array<i64: 1, 128, 384>}, {transform_indices = @transform_5, window_bounds = array<i64: 1, 1, 384>}, {transform_indices = @transform_6, window_bounds = array<i64: 1, 1, 128>}, {pipeline_mode = #tpu.pipeline_mode<synchronous>, transform_indices = @transform_7, window_bounds = array<i64: 1, 16, 128>}, {transform_indices = @transform_8, window_bounds = array<i64: 1, 16, 128>}]} {
    %c0 = arith.constant 0 : index
    %c0_0 = arith.constant 0 : index
    %c0_1 = arith.constant 0 : index
    %0 = vector.load %arg6[%c0, %c0_0, %c0_1] : memref<1x1x384xf32, #tpu.memory_space<vmem>>, vector<1x1x384xf32>
    %1 = vector.shape_cast %0 : vector<1x1x384xf32> to vector<1x384xf32>
    %c0_2 = arith.constant 0 : index
    %c0_3 = arith.constant 0 : index
    %c0_4 = arith.constant 0 : index
    %2 = vector.load %arg7[%c0_2, %c0_3, %c0_4] : memref<1x1x128xf32, #tpu.memory_space<vmem>>, vector<1x1x128xf32>
    %3 = vector.shape_cast %2 : vector<1x1x128xf32> to vector<1x128xf32>
    %c0_i32 = arith.constant 0 : i32
    %4 = arith.cmpi eq, %arg0, %c0_i32 : i32
    %5 = arith.extui %4 : i1 to i32
    %c0_i32_5 = arith.constant 0 : i32
    %6 = arith.cmpi ne, %5, %c0_i32_5 : i32
    scf.if %6 {
      %c0_8 = arith.constant 0 : index
      %c0_9 = arith.constant 0 : index
      %c0_10 = arith.constant 0 : index
      %10 = vector.load %arg2[%c0_8, %c0_9, %c0_10] : memref<1x16x128xf32, #tpu.memory_space<vmem>>, vector<1x16x128xf32>
      %11 = vector.shape_cast %10 : vector<1x16x128xf32> to vector<16x128xf32>
      %c0_i32_11 = arith.constant 0 : i32
      %12 = arith.index_cast %c0_i32_11 : i32 to index
      %c0_12 = arith.constant 0 : index
      %c0_13 = arith.constant 0 : index
      %13 = vector.load %arg1[%12, %c0_12, %c0_13] : memref<1x16x128xbf16, #tpu.memory_space<vmem>>, vector<1x16x128xbf16>
      %14 = vector.shape_cast %13 : vector<1x16x128xbf16> to vector<16x128xbf16>
      %c0_14 = arith.constant 0 : index
      %c0_15 = arith.constant 0 : index
      %15 = vector.load %arg3[%c0_14, %c0_15] : memref<128x384xbf16, #tpu.memory_space<vmem>>, vector<128x384xbf16>
      %cst = arith.constant dense<0.000000e+00> : vector<16x384xf32>
      %16 = tpu.matmul %14, %15, %cst {dimension_numbers = #tpu.dot_dimension_numbers<[1], [0], [0], [1], [0, 0, 1, 1], [], []>} : vector<16x128xbf16>, vector<128x384xbf16>, vector<16x384xf32> -> vector<16x384xf32>
      %17 = vector.broadcast %1 : vector<1x384xf32> to vector<16x384xf32>
      %18 = arith.addf %16, %17 : vector<16x384xf32>
      %19 = arith.truncf %11 : vector<16x128xf32> to vector<16x128xbf16>
      %c0_16 = arith.constant 0 : index
      %c0_17 = arith.constant 0 : index
      %c0_18 = arith.constant 0 : index
      %20 = vector.load %arg5[%c0_16, %c0_17, %c0_18] : memref<1x128x384xbf16, #tpu.memory_space<vmem>>, vector<1x128x384xbf16>
      %21 = vector.shape_cast %20 : vector<1x128x384xbf16> to vector<128x384xbf16>
      %cst_19 = arith.constant dense<0.000000e+00> : vector<16x384xf32>
      %22 = tpu.matmul %19, %21, %cst_19 {dimension_numbers = #tpu.dot_dimension_numbers<[1], [0], [0], [1], [0, 0, 1, 1], [], []>} : vector<16x128xbf16>, vector<128x384xbf16>, vector<16x384xf32> -> vector<16x384xf32>
      %23 = vector.extract_strided_slice %18 {offsets = [0, 0], sizes = [16, 128], strides = [1, 1]} : vector<16x384xf32> to vector<16x128xf32>
      %24 = vector.extract_strided_slice %22 {offsets = [0, 0], sizes = [16, 128], strides = [1, 1]} : vector<16x384xf32> to vector<16x128xf32>
      %25 = arith.addf %23, %24 : vector<16x128xf32>
      %26 = arith.negf %25 : vector<16x128xf32>
      %27 = math.exp %26 : vector<16x128xf32>
      %cst_20 = arith.constant 1.000000e+00 : f32
      %28 = vector.broadcast %cst_20 : f32 to vector<16x128xf32>
      %29 = arith.addf %28, %27 : vector<16x128xf32>
      %30 = arith.divf %28, %29 : vector<16x128xf32>
      %31 = vector.extract_strided_slice %18 {offsets = [0, 128], sizes = [16, 128], strides = [1, 1]} : vector<16x384xf32> to vector<16x128xf32>
      %32 = vector.extract_strided_slice %22 {offsets = [0, 128], sizes = [16, 128], strides = [1, 1]} : vector<16x384xf32> to vector<16x128xf32>
      %33 = arith.addf %31, %32 : vector<16x128xf32>
      %34 = arith.negf %33 : vector<16x128xf32>
      %35 = math.exp %34 : vector<16x128xf32>
      %cst_21 = arith.constant 1.000000e+00 : f32
      %36 = vector.broadcast %cst_21 : f32 to vector<16x128xf32>
      %37 = arith.addf %36, %35 : vector<16x128xf32>
      %38 = arith.divf %36, %37 : vector<16x128xf32>
      %39 = vector.extract_strided_slice %18 {offsets = [0, 256], sizes = [16, 128], strides = [1, 1]} : vector<16x384xf32> to vector<16x128xf32>
      %40 = vector.extract_strided_slice %22 {offsets = [0, 256], sizes = [16, 128], strides = [1, 1]} : vector<16x384xf32> to vector<16x128xf32>
      %41 = vector.broadcast %3 : vector<1x128xf32> to vector<16x128xf32>
      %42 = arith.addf %40, %41 : vector<16x128xf32>
      %43 = arith.mulf %30, %42 : vector<16x128xf32>
      %44 = arith.addf %39, %43 : vector<16x128xf32>
      %45 = math.tanh %44 : vector<16x128xf32>
      %cst_22 = arith.constant 1.000000e+00 : f32
      %46 = vector.broadcast %cst_22 : f32 to vector<16x128xf32>
      %47 = arith.subf %46, %38 : vector<16x128xf32>
      %48 = arith.mulf %47, %45 : vector<16x128xf32>
      %49 = arith.mulf %38, %11 : vector<16x128xf32>
      %50 = arith.addf %48, %49 : vector<16x128xf32>
      %51 = arith.truncf %50 : vector<16x128xf32> to vector<16x128xbf16>
      %52 = arith.index_cast %c0_i32_11 : i32 to index
      %c0_23 = arith.constant 0 : index
      %c0_24 = arith.constant 0 : index
      %53 = vector.load %arg10[%52, %c0_23, %c0_24] : memref<1x16x128xbf16, #tpu.memory_space<vmem>>, vector<1x16x128xbf16>
      %54 = vector.shape_cast %53 : vector<1x16x128xbf16> to vector<16x128xbf16>
      %55 = vector.shape_cast %51 : vector<16x128xbf16> to vector<1x16x128xbf16>
      tpu.vector_store %arg10[%52, %c0_23, %c0_24], %55 {strides = array<i32>} : memref<1x16x128xbf16, #tpu.memory_space<vmem>>, vector<1x16x128xbf16>,
      %56 = arith.index_cast %c0_i32_11 : i32 to index
      %c0_25 = arith.constant 0 : index
      %c0_26 = arith.constant 0 : index
      %57 = vector.load %arg8[%56, %c0_25, %c0_26] : memref<1x16x128xf32, #tpu.memory_space<vmem>>, vector<1x16x128xf32>
      %58 = vector.shape_cast %57 : vector<1x16x128xf32> to vector<16x128xf32>
      %59 = vector.shape_cast %50 : vector<16x128xf32> to vector<1x16x128xf32>
      tpu.vector_store %arg8[%56, %c0_25, %c0_26], %59 {strides = array<i32>} : memref<1x16x128xf32, #tpu.memory_space<vmem>>, vector<1x16x128xf32>,
      %c1_i32 = arith.constant 1 : i32
      %c0_27 = arith.constant 0 : index
      %c0_28 = arith.constant 0 : index
      %c0_29 = arith.constant 0 : index
      %60 = vector.load %arg9[%c0_27, %c0_28, %c0_29] : memref<1x16x128xf32, #tpu.memory_space<vmem>>, vector<1x16x128xf32>
      %61 = vector.shape_cast %60 : vector<1x16x128xf32> to vector<16x128xf32>
      %62 = vector.shape_cast %50 : vector<16x128xf32> to vector<1x16x128xf32>
      tpu.vector_store %arg9[%c0_27, %c0_28, %c0_29], %62 {strides = array<i32>} : memref<1x16x128xf32, #tpu.memory_space<vmem>>, vector<1x16x128xf32>,
    } else {
    }
    %c0_i32_6 = arith.constant 0 : i32
    %7 = arith.cmpi sgt, %arg0, %c0_i32_6 : i32
    %8 = arith.extui %7 : i1 to i32
    %c0_i32_7 = arith.constant 0 : i32
    %9 = arith.cmpi ne, %8, %c0_i32_7 : i32
    scf.if %9 {
      %c0_8 = arith.constant 0 : index
      %c0_9 = arith.constant 0 : index
      %c0_10 = arith.constant 0 : index
      %10 = vector.load %arg2[%c0_8, %c0_9, %c0_10] : memref<1x16x128xf32, #tpu.memory_space<vmem>>, vector<1x16x128xf32>
      %11 = vector.shape_cast %10 : vector<1x16x128xf32> to vector<16x128xf32>
      %c0_i32_11 = arith.constant 0 : i32
      %12 = arith.index_cast %c0_i32_11 : i32 to index
      %c0_12 = arith.constant 0 : index
      %c0_13 = arith.constant 0 : index
      %13 = vector.load %arg10[%12, %c0_12, %c0_13] : memref<1x16x128xbf16, #tpu.memory_space<vmem>>, vector<1x16x128xbf16>
      %14 = vector.shape_cast %13 : vector<1x16x128xbf16> to vector<16x128xbf16>
      %c0_14 = arith.constant 0 : index
      %c0_15 = arith.constant 0 : index
      %c0_16 = arith.constant 0 : index
      %15 = vector.load %arg4[%c0_14, %c0_15, %c0_16] : memref<1x128x384xbf16, #tpu.memory_space<vmem>>, vector<1x128x384xbf16>
      %16 = vector.shape_cast %15 : vector<1x128x384xbf16> to vector<128x384xbf16>
      %cst = arith.constant dense<0.000000e+00> : vector<16x384xf32>
      %17 = tpu.matmul %14, %16, %cst {dimension_numbers = #tpu.dot_dimension_numbers<[1], [0], [0], [1], [0, 0, 1, 1], [], []>} : vector<16x128xbf16>, vector<128x384xbf16>, vector<16x384xf32> -> vector<16x384xf32>
      %18 = vector.broadcast %1 : vector<1x384xf32> to vector<16x384xf32>
      %19 = arith.addf %17, %18 : vector<16x384xf32>
      %20 = arith.truncf %11 : vector<16x128xf32> to vector<16x128xbf16>
      %c0_17 = arith.constant 0 : index
      %c0_18 = arith.constant 0 : index
      %c0_19 = arith.constant 0 : index
      %21 = vector.load %arg5[%c0_17, %c0_18, %c0_19] : memref<1x128x384xbf16, #tpu.memory_space<vmem>>, vector<1x128x384xbf16>
      %22 = vector.shape_cast %21 : vector<1x128x384xbf16> to vector<128x384xbf16>
      %cst_20 = arith.constant dense<0.000000e+00> : vector<16x384xf32>
      %23 = tpu.matmul %20, %22, %cst_20 {dimension_numbers = #tpu.dot_dimension_numbers<[1], [0], [0], [1], [0, 0, 1, 1], [], []>} : vector<16x128xbf16>, vector<128x384xbf16>, vector<16x384xf32> -> vector<16x384xf32>
      %24 = vector.extract_strided_slice %19 {offsets = [0, 0], sizes = [16, 128], strides = [1, 1]} : vector<16x384xf32> to vector<16x128xf32>
      %25 = vector.extract_strided_slice %23 {offsets = [0, 0], sizes = [16, 128], strides = [1, 1]} : vector<16x384xf32> to vector<16x128xf32>
      %26 = arith.addf %24, %25 : vector<16x128xf32>
      %27 = arith.negf %26 : vector<16x128xf32>
      %28 = math.exp %27 : vector<16x128xf32>
      %cst_21 = arith.constant 1.000000e+00 : f32
      %29 = vector.broadcast %cst_21 : f32 to vector<16x128xf32>
      %30 = arith.addf %29, %28 : vector<16x128xf32>
      %31 = arith.divf %29, %30 : vector<16x128xf32>
      %32 = vector.extract_strided_slice %19 {offsets = [0, 128], sizes = [16, 128], strides = [1, 1]} : vector<16x384xf32> to vector<16x128xf32>
      %33 = vector.extract_strided_slice %23 {offsets = [0, 128], sizes = [16, 128], strides = [1, 1]} : vector<16x384xf32> to vector<16x128xf32>
      %34 = arith.addf %32, %33 : vector<16x128xf32>
      %35 = arith.negf %34 : vector<16x128xf32>
      %36 = math.exp %35 : vector<16x128xf32>
      %cst_22 = arith.constant 1.000000e+00 : f32
      %37 = vector.broadcast %cst_22 : f32 to vector<16x128xf32>
      %38 = arith.addf %37, %36 : vector<16x128xf32>
      %39 = arith.divf %37, %38 : vector<16x128xf32>
      %40 = vector.extract_strided_slice %19 {offsets = [0, 256], sizes = [16, 128], strides = [1, 1]} : vector<16x384xf32> to vector<16x128xf32>
      %41 = vector.extract_strided_slice %23 {offsets = [0, 256], sizes = [16, 128], strides = [1, 1]} : vector<16x384xf32> to vector<16x128xf32>
      %42 = vector.broadcast %3 : vector<1x128xf32> to vector<16x128xf32>
      %43 = arith.addf %41, %42 : vector<16x128xf32>
      %44 = arith.mulf %31, %43 : vector<16x128xf32>
      %45 = arith.addf %40, %44 : vector<16x128xf32>
      %46 = math.tanh %45 : vector<16x128xf32>
      %cst_23 = arith.constant 1.000000e+00 : f32
      %47 = vector.broadcast %cst_23 : f32 to vector<16x128xf32>
      %48 = arith.subf %47, %39 : vector<16x128xf32>
      %49 = arith.mulf %48, %46 : vector<16x128xf32>
      %50 = arith.mulf %39, %11 : vector<16x128xf32>
      %51 = arith.addf %49, %50 : vector<16x128xf32>
      %52 = arith.truncf %51 : vector<16x128xf32> to vector<16x128xbf16>
      %53 = arith.index_cast %c0_i32_11 : i32 to index
      %c0_24 = arith.constant 0 : index
      %c0_25 = arith.constant 0 : index
      %54 = vector.load %arg10[%53, %c0_24, %c0_25] : memref<1x16x128xbf16, #tpu.memory_space<vmem>>, vector<1x16x128xbf16>
      %55 = vector.shape_cast %54 : vector<1x16x128xbf16> to vector<16x128xbf16>
      %56 = vector.shape_cast %52 : vector<16x128xbf16> to vector<1x16x128xbf16>
      tpu.vector_store %arg10[%53, %c0_24, %c0_25], %56 {strides = array<i32>} : memref<1x16x128xbf16, #tpu.memory_space<vmem>>, vector<1x16x128xbf16>,
      %57 = arith.index_cast %c0_i32_11 : i32 to index
      %c0_26 = arith.constant 0 : index
      %c0_27 = arith.constant 0 : index
      %58 = vector.load %arg8[%57, %c0_26, %c0_27] : memref<1x16x128xf32, #tpu.memory_space<vmem>>, vector<1x16x128xf32>
      %59 = vector.shape_cast %58 : vector<1x16x128xf32> to vector<16x128xf32>
      %60 = vector.shape_cast %51 : vector<16x128xf32> to vector<1x16x128xf32>
      tpu.vector_store %arg8[%57, %c0_26, %c0_27], %60 {strides = array<i32>} : memref<1x16x128xf32, #tpu.memory_space<vmem>>, vector<1x16x128xf32>,
      %c1_i32 = arith.constant 1 : i32
      %c0_28 = arith.constant 0 : index
      %c0_29 = arith.constant 0 : index
      %c0_30 = arith.constant 0 : index
      %61 = vector.load %arg9[%c0_28, %c0_29, %c0_30] : memref<1x16x128xf32, #tpu.memory_space<vmem>>, vector<1x16x128xf32>
      %62 = vector.shape_cast %61 : vector<1x16x128xf32> to vector<16x128xf32>
      %63 = vector.shape_cast %51 : vector<16x128xf32> to vector<1x16x128xf32>
      tpu.vector_store %arg9[%c0_28, %c0_29, %c0_30], %63 {strides = array<i32>} : memref<1x16x128xf32, #tpu.memory_space<vmem>>, vector<1x16x128xf32>,
    } else {
    }
    return
  }
  func.func @transform_0(%arg0: i32) -> (i32, i32, i32) {
    %c0_i32 = arith.constant 0 : i32
    %c0_i32_0 = arith.constant 0 : i32
    %c0_i32_1 = arith.constant 0 : i32
    %c0_i32_2 = arith.constant 0 : i32
    return %c0_i32, %c0_i32_0, %c0_i32_1 : i32, i32, i32
  }
  func.func @transform_1(%arg0: i32) -> (i32, i32, i32) {
    %c0_i32 = arith.constant 0 : i32
    %c0_i32_0 = arith.constant 0 : i32
    %c0_i32_1 = arith.constant 0 : i32
    return %arg0, %c0_i32, %c0_i32_0 : i32, i32, i32
  }
  func.func @transform_2(%arg0: i32) -> (i32, i32) {
    %c0_i32 = arith.constant 0 : i32
    %c0_i32_0 = arith.constant 0 : i32
    %c0_i32_1 = arith.constant 0 : i32
    return %c0_i32, %c0_i32_0 : i32, i32
  }
  func.func @transform_3(%arg0: i32) -> (i32, i32, i32) {
    %c1_i32 = arith.constant 1 : i32
    %0 = arith.subi %arg0, %c1_i32 : i32
    %c0_i32 = arith.constant 0 : i32
    %1 = arith.maxsi %0, %c0_i32 : i32
    %c0_i32_0 = arith.constant 0 : i32
    %c0_i32_1 = arith.constant 0 : i32
    %c0_i32_2 = arith.constant 0 : i32
    return %1, %c0_i32_0, %c0_i32_1 : i32, i32, i32
  }
  func.func @transform_4(%arg0: i32) -> (i32, i32, i32) {
    %c0_i32 = arith.constant 0 : i32
    %c0_i32_0 = arith.constant 0 : i32
    %c0_i32_1 = arith.constant 0 : i32
    return %arg0, %c0_i32, %c0_i32_0 : i32, i32, i32
  }
  func.func @transform_5(%arg0: i32) -> (i32, i32, i32) {
    %c0_i32 = arith.constant 0 : i32
    %c0_i32_0 = arith.constant 0 : i32
    %c0_i32_1 = arith.constant 0 : i32
    return %arg0, %c0_i32, %c0_i32_0 : i32, i32, i32
  }
  func.func @transform_6(%arg0: i32) -> (i32, i32, i32) {
    %c0_i32 = arith.constant 0 : i32
    %c0_i32_0 = arith.constant 0 : i32
    %c0_i32_1 = arith.constant 0 : i32
    return %arg0, %c0_i32, %c0_i32_0 : i32, i32, i32
  }
  func.func @transform_7(%arg0: i32) -> (i32, i32, i32) {
    %c0_i32 = arith.constant 0 : i32
    %c0_i32_0 = arith.constant 0 : i32
    %c0_i32_1 = arith.constant 0 : i32
    %c0_i32_2 = arith.constant 0 : i32
    return %c0_i32, %c0_i32_0, %c0_i32_1 : i32, i32, i32
  }
  func.func @transform_8(%arg0: i32) -> (i32, i32, i32) {
    %c0_i32 = arith.constant 0 : i32
    %c0_i32_0 = arith.constant 0 : i32
    %c0_i32_1 = arith.constant 0 : i32
    return %arg0, %c0_i32, %c0_i32_0 : i32, i32, i32
  }
}

</mosaic_0001>

<bundles_post_ra>
// kernel: stacked_gru_decode.1
= control target key start
LH: loop header
LB: loop body
LE: loop exit
PB: predicated region body
PF: predicated region fallthrough
CT: control target
= control target key end

     0   :  { %s2952_s0 = inlined_call_operand.vmem [shape: bf16[1,16,128], index: 0, kind: input, shape index: {}]   ;;  %s2953_s1 = inlined_call_operand.vmem [shape: f32[3,16,128], index: 1, kind: input, shape index: {}]   ;;  %s2954_s2 = inlined_call_operand.hbm [shape: bf16[128,384], index: 2, kind: input, shape index: {}]   ;;  %s2955_s3 = inlined_call_operand.hbm [shape: bf16[2,128,384], index: 3, kind: input, shape index: {}]   ;;  %s2956_s4 = inlined_call_operand.hbm [shape: bf16[3,128,384], index: 4, kind: input, shape index: {}]   ;;  %s2957_s5 = inlined_call_operand.vmem [shape: f32[3,1,384], index: 5, kind: input, shape index: {}]   ;;  %s2958_s6 = inlined_call_operand.vmem [shape: f32[3,1,128], index: 6, kind: input, shape index: {}]   ;;  %s2959_s7 = inlined_call_operand.vmem [shape: f32[1,16,128], index: 7, kind: output, shape index: {0}]   ;;  %s2960_s8 = inlined_call_operand.vmem [shape: f32[3,16,128], index: 8, kind: output, shape index: {1}]  }
   0x1   :  { %2966 = sst [smem:[#allocation14_spill]] %s2954_s2 }
   0x2   :  { %2967 = sst [smem:[#allocation15_spill]] %s2955_s3 }
   0x3   :  { %2968 = sst [smem:[#allocation16_spill]] %s2959_s7 }
   0x4   :  { %14 = vsyncpa [#allocation4], 0 }
   0x5   :  { %15 = vsyncpa [#allocation6], 0 }
   0x6   :  { %17 = vsyncpa [#allocation6 + $0x1], 0  ;;  %s2514_s27 = smov 0   ;;  %s2516_s28 = smov 0  }
   0x7   :  { %s2518_s29 = smov 0   ;;  %s2520_s30 = smov 0  }
   0x8   :  { %s2522_s9 = smov 0   ;;  %s2524_s10 = smov 0  }
   0x9   :  { %s2526_s11 = smov 0  }
   0xa LB: > { %2969 = sst [smem:[#allocation11_spill]] %s2460_s10  ;;  %s2550_s12 = sadd.s32 4294967295, %s2464_s11   ;;  %s2464_s11 = sphi %s2526_s11, %s2982_s11   ;;  %s2460_s10 = sphi %s2524_s10, %s2984_s10   ;;  %s2456_s9 = sphi %s2522_s9, %s2989_s9   ;;  %s2452_s30 = sphi %s2520_s30, %s2988_s30   ;;  %s2448_s29 = sphi %s2518_s29, %s2987_s29   ;;  %s2444_s28 = sphi %s2516_s28, %s2986_s28   ;;  %s2440_s27 = sphi %s2514_s27, %s2985_s27  }
   0xb   : > { %s2553_s13 = sadd.s32 1, %s2464_s11   ;;  %p96_p0 = scmp.gt.s32.totalorder %s2550_s12, 0 }
   0xc   : > { %2970 = sst [smem:[#allocation12_spill]] %s2553_s13  ;;  %s1653_s14 = sadd.s32 4294967295, %s2553_s13 }
   0xd   : > { %p99_p1 = scmp.gt.s32.totalorder %s1653_s14, 0  ;;  %s104_s15 = sadd.s32 1, %s2460_s10 }
   0xe   : > { %s97_s16 = scalar_select %p96_p0, %s2550_s12, 0 }
   0xf   : > { %s2991_s14 = smov (!%p99_p1, %s1653_s14), 0  ;;  %p111_p2 = scmp.ne.s32.totalorder %s2460_s10, %s2456_s9 }
  0x10   : > { %p112_p3 = scmp.eq.s32.totalorder %s2464_s11, 0  ;;  %s101_s17 = ssub.s32 %s97_s16, %s2991_s14 }
  0x11   : > { %p117_p4 = scmp.ne.s32.totalorder %s2456_s9, %s2452_s30  ;;  %p102_p5 = scmp.eq.s32.totalorder %s101_s17, 0 }
  0x12   : > { %p113_p6 = por %p112_p3, %p111_p2  ;;  %s127_s18 = ssub.s32 %s2464_s11, %s2553_s13 }
  0x13   : > { %p1655_p7 = scmp.ne.s32.totalorder %s2550_s12, 0  ;;  %p2572_p8 = scmp.eq.s32.totalorder %s127_s18, 0 }
  0x14   : > { %s2570_s19 = scalar_select %p102_p5, %s2460_s10, %s104_s15  }
  0x15   : > { %p2207_p9 = scmp.lt.s32.totalorder %s2464_s11, 3  ;;  %s291_s21 = sand.u32 1, %s2464_s11  }
  0x16   : > { %2971 = sst [smem:[#allocation13_spill]] %s2570_s19  ;;  %s293_s22 = sand.u32 1, %s2460_s10  }
  0x17   : > { %s2180_s23 = smul.u32 192, %s293_s22  ;;  %p2581_p10 = pnand %p2207_p9, %p113_p6 }
  0x18   : > { %s2181_s25 = smul.u32 192, %s97_s16  ;;  %s2974_s3 = sld [smem:[#allocation15_spill]] }
  0x19   : > { %s295_s17 = scalar_lea.vmem [#allocation5], %s2180_s23  ;;  %s2588_s13 = scalar_lea.sflag [#allocation6], %s291_s21 }
  0x1a   : > { %s306_s18 = sshll.u32 %s295_s17, 4  ;;  %p2312_p12 = pneg %p2581_p10  ;;  %s307_s18 = int_to_ptr.vmem [resolvable:$true] %s306_s18 }
  0x1e   : > { %s303_s15 = scalar_lea.hbm %s2974_s3, %s2181_s25  ;;  %s2315_s26 = scalar_lea.hbm %s2974_s3, 384 }
  0x1f   : > { %s304_s19 = sshll.u32 %s303_s15, 4  ;;  %s305_s19 = int_to_ptr.hbm [resolvable:$true] %s304_s19 }
  0x20   : > { %s2308_s10 = sshra.s32 %s305_s19, 4  ;;  %s2309_s10 = int_to_ptr.hbm [resolvable:$true] %s2308_s10 }
  0x21   : > { %s2310_s22 = scalar_lea.hbm %s2309_s10, 192  ;;  %p2316_p1 = scmp.lt.s32.totalorder %s2309_s10, %s2974_s3 }
  0x22   : > { %p2311_p11 = scmp.ne.s32.totalorder %s2309_s10, %s2310_s22  ;;  %p2317_p2 = scmp.lt.s32.totalorder %s2315_s26, %s2310_s22 }
  0x24   : > { %p2313_p13 = pnand %p2312_p12, %p2311_p11  ;;  %p2318_p5 = por %p2317_p2, %p2316_p1 }
  0x26   : > { %p2314_p0 = pneg %p2313_p13 }
  0x28   : > { %p2319_p6 = pnand %p2318_p5, %p2314_p0 }
  0x2a   : > { %2322 = shalt.err (!%p2319_p6)
}
  0x2b   : > { %s2466_s21 = smov 192   ;;  %s2467_s7 = smov 12  }
  0x2c   : > { %2202 = dma.hbm_to_vmem [thread:$0]  (!%p2581_p10), %s305_s19, 3072, %s307_s18, %s2588_s13, %s2466_s21, %s2466_s21, %s2467_s7  }
  0x2d   : > { %p118_p11 = scmp.eq.s32.totalorder %s2550_s12, 0  ;;  %p143_p12 = scmp.ne.s32.totalorder %s2444_s28, %s2440_s27 }
  0x2e   : > { %p1654_p13 = scmp.ge.s32.totalorder %s2464_s11, 1  ;;  %p253_p0 = scmp.lt.s32.totalorder %s2464_s11, 4 }
  0x2f   : > { %p2614_p1 = por %p118_p11, %p117_p4  ;;  %p2620_p2 = por %p143_p12, %p118_p11 }
  0x30   : > { %p2624_p10 = pnand %p1654_p13, %p253_p0  ;;  %s2978_s2 = sld [smem:[#allocation14_spill]] }
  0x31   : > { %s2468_s15 = smov [#allocation3]   ;;  %s130_s18 = sadd.s32 1, %s2448_s29 }
  0x32   : > { %p2195_p4 = pneg %p2624_p10  ;;  %s269_s17 = sshll.u32 %s2468_s15, 4  ;;  %s270_s17 = int_to_ptr.vmem [resolvable:$true] %s269_s17 }
  0x33   : > { %p137_p6 = scmp.ne.s32.totalorder %s2448_s29, %s2444_s28  ;;  %s318_s22 = sand.u32 1, %s2448_s29  }
  0x34   : > { %p2196_p5 = pnand %p2195_p4, %p118_p11  ;;  %s2182_s26 = smul.u32 192, %s318_s22 }
  0x35   : > { %s2645_s16 = scalar_select %p2572_p8, %s2448_s29, %s130_s18  }
  0x36   : > { %s267_s30 = sshll.u32 %s2978_s2, 4  ;;  %p139_p12 = por %p137_p6, %p112_p3  ;;  %s268_s30 = int_to_ptr.hbm [resolvable:$true] %s267_s30 }
  0x37   : > { %2198 = dma.hbm_to_vmem [thread:$0]  (!%p2196_p5), %s268_s30, 3072, %s270_s17, [#allocation4], %s2466_s21, %s2466_s21, %s2467_s7  }
  0x38   : > { %s2183_s25 = smul.u32 192, %s2464_s11  ;;  %p2652_p13 = pnand %p2207_p9, %p139_p12 }
  0x39   : > { %s320_s2 = scalar_lea.vmem [#allocation7], %s2182_s26  ;;  %s2375_s22 = scalar_lea.hbm %s2956_s4, 576 }
  0x3a   : > { %s325_s15 = scalar_lea.hbm %s2956_s4, %s2183_s25  ;;  %s328_s3 = sshll.u32 %s320_s2, 4  ;;  %s329_s3 = int_to_ptr.vmem [resolvable:$true] %s328_s3 }
  0x3b   : > { %s326_s30 = sshll.u32 %s325_s15, 4  ;;  %p2372_p8 = pneg %p2652_p13  ;;  %s327_s30 = int_to_ptr.hbm [resolvable:$true] %s326_s30 }
  0x3c   : > { %s2368_s20 = sshra.s32 %s327_s30, 4  ;;  %s2369_s20 = int_to_ptr.hbm [resolvable:$true] %s2368_s20 }
  0x3d   : > { %s2370_s17 = scalar_lea.hbm %s2369_s20, 192  ;;  %p2376_p4 = scmp.lt.s32.totalorder %s2369_s20, %s2956_s4 }
  0x3e   : > { %p2371_p3 = scmp.ne.s32.totalorder %s2369_s20, %s2370_s17  ;;  %p2377_p5 = scmp.lt.s32.totalorder %s2375_s22, %s2370_s17 }
  0x40   : > { %p2373_p9 = pnand %p2372_p8, %p2371_p3  ;;  %p2378_p6 = por %p2377_p5, %p2376_p4 }
  0x42   : > { %p2374_p0 = pneg %p2373_p9 }
  0x44   : > { %p2379_p12 = pnand %p2378_p6, %p2374_p0 }
  0x46   : > { %2382 = shalt.err (!%p2379_p12)
}
  0x47   : > { %2205 = dma.hbm_to_vmem [thread:$0]  (!%p2652_p13), %s327_s30, 3072, %s329_s3, %s2588_s13, %s2466_s21, %s2466_s21, %s2467_s7  }
  0x48   : > { %353 = sbr.rel (%p2624_p10) target bundleno = 585 (0x249), region = 48 }
  0x4d   : > { %2427 = dma.done.wait (%p118_p11), [#allocation4], 3072  }
  0x4e   : > { %2429 = vsyncadd (%p118_p11), [#allocation4], 4294964224  ;;  %s360_s2 = sand.u32 1, %s2550_s12   ;;  %s362_s26 = sand.u32 1, %s2456_s9  }
  0x4f   : > { %s2184_s25 = smul.u32 192, %s362_s26  ;;  %s361_s23 = scalar_lea.sflag [#allocation6], %s360_s2 }
  0x51   : > { %s2681_s15 = scalar_lea.vmem [#allocation5], %s2184_s25 }
  0x52   : > { %2431 = dma.done.wait (%p2614_p1), %s361_s23, 3072  }
  0x53   : > { %2433 = vsyncadd (%p2614_p1), %s361_s23, 4294964224  ;;  %s372_s3 = sand.u32 1, %s2444_s28  }
  0x54   : > { %s2185_s13 = smul.u32 192, %s372_s3 }
  0x56   : > { %s2688_s21 = scalar_lea.vmem [#allocation7], %s2185_s13 }
  0x57   : > { %2435 = dma.done.wait (%p2620_p2), %s361_s23, 3072  }
  0x58   : > { %2437 = vsyncadd (%p2620_p2), %s361_s23, 4294964224  ;;  %p425_p11 = scmp.lt.s32.totalorder %s2550_s12, 2 }
  0x5a   : > { %s426_s7 = scalar_select %p425_p11, %s2550_s12, 2 }
  0x5b   : > { %450 = sbr.rel (%p1655_p7) target bundleno = 337 (0x151), region = 64 }
  0x5c   : > { %s2070_s19 = sshll.u32 %s426_s7, 4  ;;  %s2186_s30 = smul.u32 3, %s426_s7 }
  0x5d   : > { %s2699_s17 = scalar_lea.vmem %s2953_s1, %s2070_s19  ;;  %s439_s22 = scalar_lea.vmem %s2958_s6, %s426_s7 }
  0x5e   : > { %s436_s24 = scalar_lea.vmem %s2957_s5, %s2186_s30  ;;  %s2710_s25 = scalar_lea.vmem %s2960_s8, %s2070_s19  ;;  %v2714_v1 = vld [vmem:[%s439_s22] sm:$0x1] }
  0x5f   : > { %v2712_v0 = vld [vmem:[%s436_s24] sm:$0x7]  ;;  %s2980_s19 = sld [smem:[#allocation16_spill]] (!%p1655_p7) }
  0x60   : > { %v1757_v2 = vld [vmem:[#allocation3 + $0xa8] sm:$0xf]  ;;  %v2095_v3 = vld [vmem:[#allocation3 + $0xb0] sm:$0xf0]  ;;  %v1745_v7 = vld [vmem:[#allocation3 + $0x90] sm:$0xf] }
  0x61   : > { %v1853_v4 = vld [vmem:[%s2688_s21 + $0xa8] sm:$0xf]  ;;  %v1758_v5 = vor.u32 %v2095_v3, %v1757_v2  ;;  %v2119_v6 = vld [vmem:[%s2688_s21 + $0xb0] sm:$0xf0]  ;;  %v2092_v8 = vld [vmem:[#allocation3 + $0x98] sm:$0xf0] }
  0x62   : > { %v1854_v9 = vor.u32 %v2119_v6, %v1853_v4  ;;  %v1841_v10 = vld [vmem:[%s2688_s21 + $0x90] sm:$0xf]  ;;  %v2116_v11 = vld [vmem:[%s2688_s21 + $0x98] sm:$0xf0]  ;;  %v2094_v12 = vld [vmem:[#allocation3 + $0xac] sm:$0xf]  ;;  %v1746_v13 = vor.u32 %v2092_v8, %v1745_v7 }
  0x63   : > { %628 = vmatpush.bf16.msra.mxu0 %v1758_v5  ;;  %v1759_v14 = vld [vmem:[#allocation3 + $0xb4] sm:$0xf0]  ;;  %v1842_v15 = vor.u32 %v2116_v11, %v1841_v10  ;;  %v2089_v18 = vld [vmem:[#allocation3 + $0x80] sm:$0xf0]  ;;  %v2091_v19 = vld [vmem:[#allocation3 + $0x94] sm:$0xf] }
  0x64   : > { %831 = vmatpush.bf16.msra.mxu3 %v1854_v9  ;;  %v1762_v16 = vor.u32 %v2094_v12, %v1759_v14  ;;  %v1733_v17 = vld [vmem:[#allocation3 + $0x78] sm:$0xf]  ;;  %v2113_v21 = vld [vmem:[%s2688_s21 + $0x80] sm:$0xf0]  ;;  %v1747_v22 = vld [vmem:[#allocation3 + $0x9c] sm:$0xf0] }
  0x65   : > { %v1829_v20 = vld [vmem:[%s2688_s21 + $0x78] sm:$0xf]  ;;  %v1750_v23 = vor.u32 %v2091_v19, %v1747_v22  ;;  %v1734_v24 = vor.u32 %v2089_v18, %v1733_v17  ;;  %v2088_v25 = vld [vmem:[#allocation3 + $0x7c] sm:$0xf]  ;;  %v1735_v26 = vld [vmem:[#allocation3 + $0x84] sm:$0xf0] }
  0x66   : > { %642 = vmatpush.bf16.msra.mxu1 %v1762_v16  ;;  %v1830_v27 = vor.u32 %v2113_v21, %v1829_v20  ;;  %v1721_v28 = vld [vmem:[#allocation3 + $0x60] sm:$0xf]  ;;  %v2086_v29 = vld [vmem:[#allocation3 + $0x68] sm:$0xf0]  ;;  %v1738_v32 = vor.u32 %v2088_v25, %v1735_v26  ;;  %v2085_v34 = vld [vmem:[#allocation3 + $0x64] sm:$0xf] }
  0x67   : > { %629 = vmatpush.bf16.msra.mxu0 %v1746_v13  ;;  %v1817_v30 = vld [vmem:[%s2688_s21 + $0x60] sm:$0xf]  ;;  %v2110_v31 = vld [vmem:[%s2688_s21 + $0x68] sm:$0xf0]  ;;  %v1722_v33 = vor.u32 %v2086_v29, %v1721_v28  ;;  %v1723_v35 = vld [vmem:[#allocation3 + $0x6c] sm:$0xf0] }
  0x68   : > { %832 = vmatpush.bf16.msra.mxu3 %v1842_v15  ;;  %v1818_v36 = vor.u32 %v2110_v31, %v1817_v30  ;;  %v1709_v37 = vld [vmem:[#allocation3 + $0x48] sm:$0xf]  ;;  %v2083_v38 = vld [vmem:[#allocation3 + $0x50] sm:$0xf0]  ;;  %v1726_v41 = vor.u32 %v2085_v34, %v1723_v35  ;;  %v1697_v43 = vld [vmem:[#allocation3 + $0x30] sm:$0xf] }
  0x69   : > { %v1805_v39 = vld [vmem:[%s2688_s21 + $0x48] sm:$0xf]  ;;  %v2107_v40 = vld [vmem:[%s2688_s21 + $0x50] sm:$0xf0]  ;;  %v1710_v42 = vor.u32 %v2083_v38, %v1709_v37  ;;  %v2082_v44 = vld [vmem:[#allocation3 + $0x4c] sm:$0xf] }
  0x6a   : > { %643 = vmatpush.bf16.msra.mxu1 %v1750_v23  ;;  %v1711_v45 = vld [vmem:[#allocation3 + $0x54] sm:$0xf0]  ;;  %v1806_v46 = vor.u32 %v2107_v40, %v1805_v39  ;;  %v2080_v47 = vld [vmem:[#allocation3 + $0x38] sm:$0xf0]  ;;  %v1765_v48 = vld [vmem:[#allocation3 + $0xb0] sm:$0xf] }
  0x6b   : > { %630 = vmatpush.bf16.msra.mxu0 %v1734_v24  ;;  %v2096_v49 = vld [vmem:[#allocation3 + $0xb8] sm:$0xf0]  ;;  %v1793_v50 = vld [vmem:[%s2688_s21 + $0x30] sm:$0xf]  ;;  %v1714_v53 = vor.u32 %v2082_v44, %v1711_v45  ;;  %v1753_v54 = vld [vmem:[#allocation3 + $0x98] sm:$0xf]  ;;  %v1698_v55 = vor.u32 %v2080_v47, %v1697_v43 }
  0x6c   : > { %833 = vmatpush.bf16.msra.mxu3 %v1830_v27  ;;  %v2104_v51 = vld [vmem:[%s2688_s21 + $0x38] sm:$0xf0]  ;;  %v1766_v52 = vor.u32 %v2096_v49, %v1765_v48  ;;  %v2079_v56 = vld [vmem:[#allocation3 + $0x34] sm:$0xf]  ;;  %v1699_v57 = vld [vmem:[#allocation3 + $0x3c] sm:$0xf0] }
  0x6d   : > { %v2093_v58 = vld [vmem:[#allocation3 + $0xa0] sm:$0xf0]  ;;  %v1794_v59 = vor.u32 %v2104_v51, %v1793_v50  ;;  %v1685_v60 = vld [vmem:[#allocation3 + $0x18] sm:$0xf]  ;;  %v1741_v3 = vld [vmem:[#allocation3 + $0x80] sm:$0xf]  ;;  %v1702_v5 = vor.u32 %v2079_v56, %v1699_v57 }
  0x6e   : > { %644 = vmatpush.bf16.msra.mxu1 %v1738_v32  ;;  %656 = vmatpush.bf16.msra.mxu2 %v1766_v52  ;;  %v2077_v61 = vld [vmem:[#allocation3 + $0x20] sm:$0xf0]  ;;  %v1781_v62 = vld [vmem:[%s2688_s21 + $0x18] sm:$0xf]  ;;  %v1754_v63 = vor.u32 %v2093_v58, %v1753_v54  ;;  %v2090_v4 = vld [vmem:[#allocation3 + $0x88] sm:$0xf0] }
  0x6f   : > { %631 = vmatpush.bf16.msra.mxu0 %v1722_v33  ;;  %v2101_v2 = vld [vmem:[%s2688_s21 + $0x20] sm:$0xf0]  ;;  %v1673_v6 = vld [vmem:[#allocation3] sm:$0xf]  ;;  %v1686_v7 = vor.u32 %v2077_v61, %v1685_v60  ;;  %v2074_v8 = vld [vmem:[#allocation3 + $0x8] sm:$0xf0]  ;;  %v1742_v11 = vor.u32 %v2090_v4, %v1741_v3 }
  0x70   : > { %834 = vmatpush.bf16.msra.mxu3 %v1818_v36  ;;  %v2076_v9 = vld [vmem:[#allocation3 + $0x1c] sm:$0xf]  ;;  %v1687_v10 = vld [vmem:[#allocation3 + $0x24] sm:$0xf0]  ;;  %v1782_v12 = vor.u32 %v2101_v2, %v1781_v62  ;;  %v1769_v13 = vld [vmem:[%s2688_s21] sm:$0xf]  ;;  %v1674_v21 = vor.u32 %v2074_v8, %v1673_v6 }
  0x71   : > { %v1729_v14 = vld [vmem:[#allocation3 + $0x68] sm:$0xf]  ;;  %v2087_v15 = vld [vmem:[#allocation3 + $0x70] sm:$0xf0]  ;;  %v2098_v16 = vld [vmem:[%s2688_s21 + $0x8] sm:$0xf0]  ;;  %v1690_v19 = vor.u32 %v2076_v9, %v1687_v10 }
  0x72   : > { %645 = vmatpush.bf16.msra.mxu1 %v1726_v41  ;;  %657 = vmatpush.bf16.msra.mxu2 %v1754_v63  ;;  %v2118_v17 = vld [vmem:[%s2688_s21 + $0xac] sm:$0xf]  ;;  %v1855_v18 = vld [vmem:[%s2688_s21 + $0xb4] sm:$0xf0]  ;;  %v2740_v22 = vld [vmem:[%s2699_s17 + $0x8] sm:$0xff]  ;;  %v1730_v25 = vor.u32 %v2087_v15, %v1729_v14  ;;  %v1770_v26 = vor.u32 %v2098_v16, %v1769_v13 }
  0x73   : > { %632 = vmatpush.bf16.msra.mxu0 %v1710_v42  ;;  %v2737_v20 = vld [vmem:[%s2699_s17] sm:$0xff]  ;;  %v2073_v23 = vld [vmem:[#allocation3 + $0x4] sm:$0xf]  ;;  %v1675_v24 = vld [vmem:[#allocation3 + $0xc] sm:$0xf0]  ;;  %v1858_v27 = vor.u32 %v2118_v17, %v1855_v18 }
  0x74   : > { %835 = vmatpush.bf16.msra.mxu3 %v1806_v46  ;;  %v2115_v28 = vld [vmem:[%s2688_s21 + $0x94] sm:$0xf]  ;;  %v1861_v29 = vld [vmem:[%s2688_s21 + $0xb0] sm:$0xf]  ;;  %v2120_v30 = vld [vmem:[%s2688_s21 + $0xb8] sm:$0xf0]  ;;  %v1678_v34 = vor.u32 %v2073_v23, %v1675_v24  ;;  %v2753_v36 = vpack.c.bf16 %v2740_v22, %v2737_v20 }
  0x75   : > { %v1843_v31 = vld [vmem:[%s2688_s21 + $0x9c] sm:$0xf0]  ;;  %v1717_v32 = vld [vmem:[#allocation3 + $0x50] sm:$0xf]  ;;  %v2084_v33 = vld [vmem:[#allocation3 + $0x58] sm:$0xf0]  ;;  %v1862_v37 = vor.u32 %v2120_v30, %v1861_v29 }
  0x76   : > { %646 = vmatpush.bf16.msra.mxu1 %v1714_v53  ;;  %658 = vmatpush.bf16.msra.mxu2 %v1742_v11  ;;  %v2749_v35 = vld [vmem:[%s2952_s0] sm:$0xff]  ;;  %v1846_v38 = vor.u32 %v2115_v28, %v1843_v31  ;;  %v2117_v41 = vld [vmem:[%s2688_s21 + $0xa0] sm:$0xf0]  ;;  %v1718_v42 = vor.u32 %v2084_v33, %v1717_v32  ;;  %v1831_v43 = vld [vmem:[%s2688_s21 + $0x84] sm:$0xf0]  ;;  %v488_v28 = vperm.slane %v2712_v0, 0 }
  0x77   : > { %633 = vmatpush.bf16.msra.mxu0 %v1698_v55  ;;  %v2112_v39 = vld [vmem:[%s2688_s21 + $0x7c] sm:$0xf]  ;;  %v1849_v40 = vld [vmem:[%s2688_s21 + $0x98] sm:$0xf]  ;;  %v2081_v45 = vld [vmem:[#allocation3 + $0x40] sm:$0xf0] }
  0x78   : > { %836 = vmatpush.bf16.msra.mxu3 %v1794_v59  ;;  %v1705_v44 = vld [vmem:[#allocation3 + $0x38] sm:$0xf]  ;;  %v1850_v46 = vor.u32 %v2117_v41, %v1849_v40  ;;  %v1834_v47 = vor.u32 %v2112_v39, %v1831_v43  ;;  %v2109_v48 = vld [vmem:[%s2688_s21 + $0x64] sm:$0xf]  ;;  %v1837_v49 = vld [vmem:[%s2688_s21 + $0x80] sm:$0xf] }
  0x79   : > { %v2114_v50 = vld [vmem:[%s2688_s21 + $0x88] sm:$0xf0]  ;;  %v1706_v51 = vor.u32 %v2081_v45, %v1705_v44  ;;  %v1819_v52 = vld [vmem:[%s2688_s21 + $0x6c] sm:$0xf0]  ;;  %v1693_v53 = vld [vmem:[#allocation3 + $0x20] sm:$0xf] }
  0x7a   : > { %647 = vmatpush.bf16.msra.mxu1 %v1702_v5  ;;  %659 = vmatpush.bf16.msra.mxu2 %v1730_v25  ;;  %v2078_v54 = vld [vmem:[#allocation3 + $0x28] sm:$0xf0]  ;;  %v1838_v55 = vor.u32 %v2114_v50, %v1837_v49  ;;  %v1822_v56 = vor.u32 %v2109_v48, %v1819_v52  ;;  %v1825_v58 = vld [vmem:[%s2688_s21 + $0x68] sm:$0xf]  ;;  %v2111_v59 = vld [vmem:[%s2688_s21 + $0x70] sm:$0xf0] }
  0x7b   : > { %634 = vmatpush.bf16.msra.mxu0 %v1686_v7  ;;  %v2106_v57 = vld [vmem:[%s2688_s21 + $0x4c] sm:$0xf]  ;;  %v1694_v60 = vor.u32 %v2078_v54, %v1693_v53  ;;  %v1807_v61 = vld [vmem:[%s2688_s21 + $0x54] sm:$0xf0]  ;;  %v1681_v62 = vld [vmem:[#allocation3 + $0x8] sm:$0xf]  ;;  %v1826_v2 = vor.u32 %v2111_v59, %v1825_v58 }
  0x7c   : > { %837 = vmatpush.bf16.msra.mxu3 %v1782_v12  ;;  %v2075_v63 = vld [vmem:[#allocation3 + $0x10] sm:$0xf0]  ;;  %v1810_v3 = vor.u32 %v2106_v57, %v1807_v61  ;;  %v1813_v4 = vld [vmem:[%s2688_s21 + $0x50] sm:$0xf]  ;;  %v2108_v5 = vld [vmem:[%s2688_s21 + $0x58] sm:$0xf0] }
  0x7d   : > { %v1682_v6 = vor.u32 %v2075_v63, %v1681_v62  ;;  %v2103_v7 = vld [vmem:[%s2688_s21 + $0x34] sm:$0xf]  ;;  %v1795_v8 = vld [vmem:[%s2688_s21 + $0x3c] sm:$0xf0]  ;;  %v1814_v9 = vor.u32 %v2108_v5, %v1813_v4  ;;  %v1801_v11 = vld [vmem:[%s2688_s21 + $0x38] sm:$0xf] }
  0x7e   : > { %648 = vmatpush.bf16.msra.mxu1 %v1690_v19  ;;  %660 = vmatpush.bf16.msra.mxu2 %v1718_v42  ;;  %v1798_v10 = vor.u32 %v2103_v7, %v1795_v8  ;;  %v2105_v12 = vld [vmem:[%s2688_s21 + $0x40] sm:$0xf0]  ;;  %v2100_v13 = vld [vmem:[%s2688_s21 + $0x1c] sm:$0xf]  ;;  %v1783_v14 = vld [vmem:[%s2688_s21 + $0x24] sm:$0xf0] }
  0x7f   : > { %635 = vmatpush.bf16.msra.mxu0 %v1674_v21  ;;  %v1802_v15 = vor.u32 %v2105_v12, %v1801_v11  ;;  %v1786_v16 = vor.u32 %v2100_v13, %v1783_v14  ;;  %v1789_v17 = vld [vmem:[%s2688_s21 + $0x20] sm:$0xf]  ;;  %v2102_v18 = vld [vmem:[%s2688_s21 + $0x28] sm:$0xf0]  ;;  %v2097_v19 = vld [vmem:[%s2688_s21 + $0x4] sm:$0xf] }
  0x80   : > { %838 = vmatpush.bf16.msra.mxu3 %v1770_v26  ;;  %v1771_v21 = vld [vmem:[%s2688_s21 + $0xc] sm:$0xf0]  ;;  %v1790_v23 = vor.u32 %v2102_v18, %v1789_v17  ;;  %v1777_v25 = vld [vmem:[%s2688_s21 + $0x8] sm:$0xf]  ;;  %v2099_v26 = vld [vmem:[%s2688_s21 + $0x10] sm:$0xf0] }
  0x81   : > { %v1774_v24 = vor.u32 %v2097_v19, %v1771_v21  ;;  %v954_v62 = vperm.slane %v2714_v1, 0  ;;  %v490_v8 = vperm.slane %v2712_v0, 2 }
  0x82   : > { %649 = vmatpush.bf16.msra.mxu1 %v1678_v34  ;;  %636 = vmatmul.bf16.vlgmr.msra.gmra.mxu0 %v2749_v35 }
  0x83   : > { %845 = vmatpush.bf16.msrb.mxu0 %v1858_v27  ;;  %839 = vmatmul.bf16.vlgmr.msra.gmra.mxu3 %v2753_v36  ;;  %v1778_v27 = vor.u32 %v2099_v26, %v1777_v25 }
  0x84   : > { %661 = vmatpush.bf16.msra.mxu2 %v1706_v51 }
  0x85   : > { %650 = vmatmul.bf16.vlgmr.msra.gmra.mxu1 %v2749_v35 }
  0x86   : > { %859 = vmatpush.bf16.msrb.mxu1 %v1862_v37 }
  0x87   : > { %846 = vmatpush.bf16.msrb.mxu0 %v1846_v38 }
  0x88   : > { %662 = vmatpush.bf16.msra.mxu2 %v1694_v60 }
  0x8a   : > { %860 = vmatpush.bf16.msrb.mxu1 %v1850_v46 }
  0x8b   : > { %847 = vmatpush.bf16.msrb.mxu0 %v1834_v47 }
  0x8c   : > { %663 = vmatpush.bf16.msra.mxu2 %v1682_v6 }
  0x8e   : > { %861 = vmatpush.bf16.msrb.mxu1 %v1838_v55 }
  0x8f   : > { %848 = vmatpush.bf16.msrb.mxu0 %v1822_v56  ;;  %664 = vmatmul.bf16.vlgmr.msra.gmra.mxu2 %v2749_v35 }
  0x92   : > { %862 = vmatpush.bf16.msrb.mxu1 %v1826_v2 }
  0x93   : > { %849 = vmatpush.bf16.msrb.mxu0 %v1810_v3 }
  0x96   : > { %863 = vmatpush.bf16.msrb.mxu1 %v1814_v9 }
  0x97   : > { %850 = vmatpush.bf16.msrb.mxu0 %v1798_v10 }
  0x9a   : > { %864 = vmatpush.bf16.msrb.mxu1 %v1802_v15 }
  0x9b   : > { %851 = vmatpush.bf16.msrb.mxu0 %v1786_v16 }
  0x9e   : > { %865 = vmatpush.bf16.msrb.mxu1 %v1790_v23 }
  0x9f   : > { %852 = vmatpush.bf16.msrb.mxu0 %v1774_v24 }
  0xa2   : > { %853 = vmatmul.bf16.vlgmr.msrb.gmra.mxu0 %v2753_v36  ;;  %866 = vmatpush.bf16.msrb.mxu1 %v1778_v27 }
  0xa5   : > { %867 = vmatmul.bf16.vlgmr.msrb.gmra.mxu1 %v2753_v36  ;;  %v489_v36 = vperm.slane %v2712_v0, 1 }
  0xff   : > { %v637_v29 = vpop.f32.mrf.mxu0 }
 0x100   : > { %v638_v30 = vadd.f32 %v637_v29, %v488_v28 }
 0x102   : > { %v651_v42 = vpop.f32.mrf.mxu1 }
 0x103   : > { %v652_v44 = vadd.f32 %v651_v42, %v489_v36 }
 0x106   : > { %v840_v31 = vpop.f32.mrf.mxu3 }
 0x107   : > { %v873_v32 = vadd.f32 %v840_v31, %v638_v30  ;;  %v639_v33 = vpop.f32.mrf.mxu0 }
 0x108   : > { %v640_v35 = vadd.f32 %v639_v33, %v488_v28 }
 0x109   : > { %v1863_v34 = vmul.f32 -1.442695, %v873_v32 }
 0x10a   : > { %v653_v49 = vpop.f32.mrf.mxu1 }
 0x10b   : > { %2268 = vpow2.f32 %v1863_v34  ;;  %v654_v55 = vadd.f32 %v653_v49, %v489_v36 }
 0x10e   : > { %v842_v37 = vpop.f32.mrf.mxu3 }
 0x10f   : > { %v874_v38 = vadd.f32 %v842_v37, %v640_v35 }
 0x111   : > { %v2269_v39 = vpop.eup %2268  ;;  %v1864_v40 = vmul.f32 -1.442695, %v874_v38 }
 0x112   : > { %v881_v41 = vadd.f32 1.0, %v2269_v39  ;;  %v665_v12 = vpop.f32.mrf.mxu2 }
 0x113   : > { %2270 = vpow2.f32 %v1864_v40  ;;  %v666_v14 = vadd.f32 %v665_v12, %v490_v8 }
 0x114   : > { %2272 = vrcp.f32 %v881_v41  ;;  %vm888_vm0 = vweird.f32 %v881_v41  ;;  %v894_v59 = vand.u32 2147483648, %v881_v41  ;;  %v892_v61 = vand.u32 2147483647, %v881_v41 }
 0x116   : > { %v895_v7 = vor.u32 1.1754944e-38, %v894_v59  ;;  %vm893_vm3 = vcmp.eq.f32.partialorder %v892_v61, 8.507059e+37 }
 0x119   : > { %v2271_v43 = vpop.eup %2270 }
 0x11a   : > { %v2273_v45 = vpop.eup %2272  ;;  %v882_v46 = vadd.f32 1.0, %v2271_v43  ;;  %v667_v34 = vpop.f32.mrf.mxu2 }
 0x11b   : > { %v884_v47 = vmul.f32 %v2273_v45, %v881_v41  ;;  %vm889_vm1 = vweird.f32 %v2273_v45  ;;  %v668_v39 = vadd.f32 %v667_v34, %v490_v8 }
 0x11c   : > { %2274 = vrcp.f32 %v882_v46  ;;  %vm890_vm2 = vmor %vm888_vm0, %vm889_vm1  ;;  %v909_v16 = vand.u32 2147483648, %v882_v46  ;;  %vm903_vm5 = vweird.f32 %v882_v46  ;;  %v907_v18 = vand.u32 2147483647, %v882_v46 }
 0x11d   : > { %v885_v51 = vsub.f32 1.0, %v884_v47 }
 0x11e   : > { %v910_v28 = vor.u32 1.1754944e-38, %v909_v16  ;;  %vm908_vm7 = vcmp.eq.f32.partialorder %v907_v18, 8.507059e+37 }
 0x11f   : > { %v854_v48 = vpop.f32.mrf.mxu0  ;;  %v886_v53 = vmul.f32 %v2273_v45, %v885_v51 }
 0x120   : > { %v913_v50 = vadd.f32 %v854_v48, %v652_v44 }
 0x121   : > { %v887_v57 = vadd.f32 %v2273_v45, %v886_v53 }
 0x122   : > { %v1865_v52 = vmul.f32 -1.442695, %v913_v50  ;;  %v2275_v54 = vpop.eup %2274  ;;  %v868_v3 = vpop.f32.mrf.mxu1 }
 0x123   : > { %v899_v56 = vmul.f32 %v2275_v54, %v882_v46  ;;  %v891_v6 = vsel %vm890_vm2, %v2273_v45, %v887_v57  ;;  %v956_v9 = vadd.f32 %v954_v62, %v868_v3  ;;  %vm904_vm4 = vweird.f32 %v2275_v54 }
 0x124   : > { %2276 = vpow2.f32 %v1865_v52  ;;  %v896_v11 = vsel %vm893_vm3, %v895_v7, %v891_v6  ;;  %vm905_vm6 = vmor %vm903_vm5, %vm904_vm4 }
 0x125   : > { %v900_v63 = vsub.f32 1.0, %v899_v56  ;;  %v958_v13 = vmul.f32 %v956_v9, %v896_v11 }
 0x127   : > { %v856_v58 = vpop.f32.mrf.mxu0  ;;  %v901_v10 = vmul.f32 %v2275_v54, %v900_v63  ;;  %v960_v24 = vadd.f32 %v958_v13, %v666_v14 }
 0x128   : > { %v914_v60 = vadd.f32 %v856_v58, %v654_v55 }
 0x129   : > { %v902_v15 = vadd.f32 %v2275_v54, %v901_v10 }
 0x12a   : > { %v2277_v2 = vpop.eup %2276  ;;  %v1866_v4 = vmul.f32 -1.442695, %v914_v60  ;;  %v870_v23 = vpop.f32.mrf.mxu1 }
 0x12b   : > { %v921_v5 = vadd.f32 1.0, %v2277_v2  ;;  %v906_v26 = vsel %vm905_vm6, %v2275_v54, %v902_v15  ;;  %v957_v30 = vadd.f32 %v954_v62, %v870_v23 }
 0x12c   : > { %v911_v33 = vsel %vm908_vm7, %v910_v28, %v906_v26 }
 0x12d   : > { %2278 = vrcp.f32 %v921_v5  ;;  %v934_v29 = vand.u32 2147483648, %v921_v5  ;;  %v932_v32 = vand.u32 2147483647, %v921_v5  ;;  %vm928_vm9 = vweird.f32 %v921_v5 }
 0x12e   : > { %2280 = vpow2.f32 %v1866_v4  ;;  %v959_v38 = vmul.f32 %v957_v30, %v911_v33 }
 0x12f   : > { %v935_v37 = vor.u32 1.1754944e-38, %v934_v29  ;;  %vm933_vm11 = vcmp.eq.f32.partialorder %v932_v32, 8.507059e+37 }
 0x130   : > { %v961_v45 = vadd.f32 %v959_v38, %v668_v39 }
 0x133   : > { %v2279_v17 = vpop.eup %2278 }
 0x134   : > { %v2281_v19 = vpop.eup %2280  ;;  %v924_v21 = vmul.f32 %v2279_v17, %v921_v5  ;;  %vm929_vm8 = vweird.f32 %v2279_v17 }
 0x135   : > { %v922_v25 = vadd.f32 1.0, %v2281_v19  ;;  %vm930_vm10 = vmor %vm928_vm9, %vm929_vm8 }
 0x136   : > { %v925_v27 = vsub.f32 1.0, %v924_v21 }
 0x137   : > { %2282 = vrcp.f32 %v922_v25  ;;  %v949_v49 = vand.u32 2147483648, %v922_v25  ;;  %v947_v52 = vand.u32 2147483647, %v922_v25  ;;  %vm943_vm13 = vweird.f32 %v922_v25 }
 0x138   : > { %v926_v31 = vmul.f32 %v2279_v17, %v925_v27  ;;  %2284 = vtanh.f32 %v960_v24 }
 0x139   : > { %2286 = vtanh.f32 %v961_v45  ;;  %v950_v54 = vor.u32 1.1754944e-38, %v949_v49  ;;  %vm948_vm15 = vcmp.eq.f32.partialorder %v947_v52, 8.507059e+37 }
 0x13a   : > { %v927_v35 = vadd.f32 %v2279_v17, %v926_v31 }
 0x13c   : > { %v931_v40 = vsel %vm930_vm10, %v2279_v17, %v927_v35 }
 0x13d   : > { %v2283_v41 = vpop.eup %2282  ;;  %v936_v42 = vsel %vm933_vm11, %v935_v37, %v931_v40 }
 0x13e   : > { %v964_v36 = vsub.f32 1.0, %v936_v42  ;;  %v939_v43 = vmul.f32 %v2283_v41, %v922_v25  ;;  %v2285_v44 = vpop.eup %2284  ;;  %v968_v47 = vmul.f32 %v936_v42, %v2737_v20  ;;  %vm944_vm12 = vweird.f32 %v2283_v41 }
 0x13f   : > { %vm945_vm14 = vmor %vm943_vm13, %vm944_vm12  ;;  %v2287_v57 = vpop.eup %2286 }
 0x140   : > { %v966_v46 = vmul.f32 %v2285_v44, %v964_v36  ;;  %v940_v48 = vsub.f32 1.0, %v939_v43 }
 0x142   : > { %v970_v50 = vadd.f32 %v968_v47, %v966_v46  ;;  %v941_v51 = vmul.f32 %v2283_v41, %v940_v48 }
 0x144   : > { %976 = vst [vmem:[%s2980_s19] sm:$0xff] %v970_v50  ;;  %v942_v53 = vadd.f32 %v2283_v41, %v941_v51 }
 0x145   : > { %978 = vst [vmem:[%s2710_s25] sm:$0xff] %v970_v50 }
 0x146   : > { %v946_v55 = vsel %vm945_vm14, %v2283_v41, %v942_v53 }
 0x147   : > { %v951_v20 = vsel %vm948_vm15, %v950_v54, %v946_v55 }
 0x148   : > { %v965_v56 = vsub.f32 1.0, %v951_v20  ;;  %v969_v59 = vmul.f32 %v951_v20, %v2740_v22 }
 0x14a   : > { %v967_v58 = vmul.f32 %v2287_v57, %v965_v56 }
 0x14c   : > { %v971_v60 = vadd.f32 %v969_v59, %v967_v58 }
 0x14e   : > { %v2173_v61 = vpack.c.bf16 %v971_v60, %v970_v50  ;;  %977 = vst [vmem:[%s2980_s19 + $0x8] sm:$0xff] %v971_v60 }
 0x14f   : > { %979 = vst [vmem:[%s2710_s25 + $0x8] sm:$0xff] %v971_v60 }
 0x150   : > { %2174 = vst [vmem:[#allocation2] sm:$0xff] %v2173_v61  }
 0x151 PF: > { %p1867_p7 = scmp.le.s32.totalorder %s2550_s12, 0 }
 0x153   : > { %983 = sbr.rel (%p1867_p7) target bundleno = 585 (0x249), region = 68 }
 0x158   : > { %v1958_v22 = vld [vmem:[%s2681_s15 + $0xa8] sm:$0xf]  ;;  %v2144_v62 = vld [vmem:[%s2681_s15 + $0xb0] sm:$0xf0]  ;;  %v1946_v4 = vld [vmem:[%s2681_s15 + $0x90] sm:$0xf] }
 0x159   : > { %v2054_v63 = vld [vmem:[%s2688_s21 + $0xa8] sm:$0xf]  ;;  %v1959_v2 = vor.u32 %v2144_v62, %v1958_v22  ;;  %v2168_v3 = vld [vmem:[%s2688_s21 + $0xb0] sm:$0xf0]  ;;  %v2141_v5 = vld [vmem:[%s2681_s15 + $0x98] sm:$0xf0] }
 0x15a   : > { %v2055_v6 = vor.u32 %v2168_v3, %v2054_v63  ;;  %v2042_v7 = vld [vmem:[%s2688_s21 + $0x90] sm:$0xf]  ;;  %v2165_v8 = vld [vmem:[%s2688_s21 + $0x98] sm:$0xf0]  ;;  %v2143_v9 = vld [vmem:[%s2681_s15 + $0xac] sm:$0xf]  ;;  %v1947_v10 = vor.u32 %v2141_v5, %v1946_v4 }
 0x15b   : > { %1161 = vmatpush.bf16.msra.mxu0 %v1959_v2  ;;  %v1960_v11 = vld [vmem:[%s2681_s15 + $0xb4] sm:$0xf0]  ;;  %v2043_v12 = vor.u32 %v2165_v8, %v2042_v7  ;;  %v2138_v15 = vld [vmem:[%s2681_s15 + $0x80] sm:$0xf0]  ;;  %v2140_v16 = vld [vmem:[%s2681_s15 + $0x94] sm:$0xf] }
 0x15c   : > { %1364 = vmatpush.bf16.msra.mxu3 %v2055_v6  ;;  %v1963_v13 = vor.u32 %v2143_v9, %v1960_v11  ;;  %v1934_v14 = vld [vmem:[%s2681_s15 + $0x78] sm:$0xf]  ;;  %v2162_v18 = vld [vmem:[%s2688_s21 + $0x80] sm:$0xf0]  ;;  %v1948_v19 = vld [vmem:[%s2681_s15 + $0x9c] sm:$0xf0] }
 0x15d   : > { %v2030_v17 = vld [vmem:[%s2688_s21 + $0x78] sm:$0xf]  ;;  %v1951_v21 = vor.u32 %v2140_v16, %v1948_v19  ;;  %v1935_v23 = vor.u32 %v2138_v15, %v1934_v14  ;;  %v2137_v24 = vld [vmem:[%s2681_s15 + $0x7c] sm:$0xf]  ;;  %v1936_v25 = vld [vmem:[%s2681_s15 + $0x84] sm:$0xf0] }
 0x15e   : > { %1175 = vmatpush.bf16.msra.mxu1 %v1963_v13  ;;  %v2031_v26 = vor.u32 %v2162_v18, %v2030_v17  ;;  %v1922_v27 = vld [vmem:[%s2681_s15 + $0x60] sm:$0xf]  ;;  %v2135_v28 = vld [vmem:[%s2681_s15 + $0x68] sm:$0xf0]  ;;  %v1939_v31 = vor.u32 %v2137_v24, %v1936_v25  ;;  %v2134_v33 = vld [vmem:[%s2681_s15 + $0x64] sm:$0xf] }
 0x15f   : > { %1162 = vmatpush.bf16.msra.mxu0 %v1947_v10  ;;  %v2018_v29 = vld [vmem:[%s2688_s21 + $0x60] sm:$0xf]  ;;  %v2159_v30 = vld [vmem:[%s2688_s21 + $0x68] sm:$0xf0]  ;;  %v1923_v32 = vor.u32 %v2135_v28, %v1922_v27  ;;  %v1924_v34 = vld [vmem:[%s2681_s15 + $0x6c] sm:$0xf0] }
 0x160   : > { %1365 = vmatpush.bf16.msra.mxu3 %v2043_v12  ;;  %v2019_v35 = vor.u32 %v2159_v30, %v2018_v29  ;;  %v1910_v37 = vld [vmem:[%s2681_s15 + $0x48] sm:$0xf]  ;;  %v2132_v38 = vld [vmem:[%s2681_s15 + $0x50] sm:$0xf0]  ;;  %v1927_v41 = vor.u32 %v2134_v33, %v1924_v34  ;;  %v1898_v36 = vld [vmem:[%s2681_s15 + $0x30] sm:$0xf] }
 0x161   : > { %v2006_v39 = vld [vmem:[%s2688_s21 + $0x48] sm:$0xf]  ;;  %v2156_v40 = vld [vmem:[%s2688_s21 + $0x50] sm:$0xf0]  ;;  %v1911_v42 = vor.u32 %v2132_v38, %v1910_v37  ;;  %v2131_v43 = vld [vmem:[%s2681_s15 + $0x4c] sm:$0xf] }
 0x162   : > { %1176 = vmatpush.bf16.msra.mxu1 %v1951_v21  ;;  %v1912_v44 = vld [vmem:[%s2681_s15 + $0x54] sm:$0xf0]  ;;  %v2007_v45 = vor.u32 %v2156_v40, %v2006_v39  ;;  %v2129_v46 = vld [vmem:[%s2681_s15 + $0x38] sm:$0xf0]  ;;  %v1966_v47 = vld [vmem:[%s2681_s15 + $0xb0] sm:$0xf] }
 0x163   : > { %1163 = vmatpush.bf16.msra.mxu0 %v1935_v23  ;;  %v2145_v48 = vld [vmem:[%s2681_s15 + $0xb8] sm:$0xf0]  ;;  %v1994_v49 = vld [vmem:[%s2688_s21 + $0x30] sm:$0xf]  ;;  %v1915_v52 = vor.u32 %v2131_v43, %v1912_v44  ;;  %v1954_v53 = vld [vmem:[%s2681_s15 + $0x98] sm:$0xf]  ;;  %v1899_v54 = vor.u32 %v2129_v46, %v1898_v36 }
 0x164   : > { %1366 = vmatpush.bf16.msra.mxu3 %v2031_v26  ;;  %v2153_v50 = vld [vmem:[%s2688_s21 + $0x38] sm:$0xf0]  ;;  %v1967_v51 = vor.u32 %v2145_v48, %v1966_v47  ;;  %v2128_v55 = vld [vmem:[%s2681_s15 + $0x34] sm:$0xf]  ;;  %v1900_v20 = vld [vmem:[%s2681_s15 + $0x3c] sm:$0xf0] }
 0x165   : > { %v2142_v56 = vld [vmem:[%s2681_s15 + $0xa0] sm:$0xf0]  ;;  %v1995_v57 = vor.u32 %v2153_v50, %v1994_v49  ;;  %v1886_v58 = vld [vmem:[%s2681_s15 + $0x18] sm:$0xf]  ;;  %v1942_v62 = vld [vmem:[%s2681_s15 + $0x80] sm:$0xf]  ;;  %v1903_v2 = vor.u32 %v2128_v55, %v1900_v20 }
 0x166   : > { %1177 = vmatpush.bf16.msra.mxu1 %v1939_v31  ;;  %1189 = vmatpush.bf16.msra.mxu2 %v1967_v51  ;;  %v2126_v59 = vld [vmem:[%s2681_s15 + $0x20] sm:$0xf0]  ;;  %v1982_v60 = vld [vmem:[%s2688_s21 + $0x18] sm:$0xf]  ;;  %v1955_v61 = vor.u32 %v2142_v56, %v1954_v53  ;;  %v2139_v63 = vld [vmem:[%s2681_s15 + $0x88] sm:$0xf0] }
 0x167   : > { %1164 = vmatpush.bf16.msra.mxu0 %v1923_v32  ;;  %v2150_v22 = vld [vmem:[%s2688_s21 + $0x20] sm:$0xf0]  ;;  %v1874_v3 = vld [vmem:[%s2681_s15] sm:$0xf]  ;;  %v1887_v4 = vor.u32 %v2126_v59, %v1886_v58  ;;  %v2123_v5 = vld [vmem:[%s2681_s15 + $0x8] sm:$0xf0]  ;;  %v1943_v8 = vor.u32 %v2139_v63, %v1942_v62 }
 0x168   : > { %1367 = vmatpush.bf16.msra.mxu3 %v2019_v35  ;;  %v2125_v6 = vld [vmem:[%s2681_s15 + $0x1c] sm:$0xf]  ;;  %v1888_v7 = vld [vmem:[%s2681_s15 + $0x24] sm:$0xf0]  ;;  %v1983_v9 = vor.u32 %v2150_v22, %v1982_v60  ;;  %v1970_v10 = vld [vmem:[%s2688_s21] sm:$0xf]  ;;  %v1875_v18 = vor.u32 %v2123_v5, %v1874_v3 }
 0x169   : > { %v1930_v11 = vld [vmem:[%s2681_s15 + $0x68] sm:$0xf]  ;;  %v2136_v12 = vld [vmem:[%s2681_s15 + $0x70] sm:$0xf0]  ;;  %v2147_v13 = vld [vmem:[%s2688_s21 + $0x8] sm:$0xf0]  ;;  %v1891_v16 = vor.u32 %v2125_v6, %v1888_v7 }
 0x16a   : > { %1178 = vmatpush.bf16.msra.mxu1 %v1927_v41  ;;  %1190 = vmatpush.bf16.msra.mxu2 %v1955_v61  ;;  %v2167_v14 = vld [vmem:[%s2688_s21 + $0xac] sm:$0xf]  ;;  %v2056_v15 = vld [vmem:[%s2688_s21 + $0xb4] sm:$0xf0]  ;;  %v2862_v19 = vld [vmem:[%s2699_s17 + $0x8] sm:$0xff]  ;;  %v1931_v24 = vor.u32 %v2136_v12, %v1930_v11  ;;  %v1971_v25 = vor.u32 %v2147_v13, %v1970_v10 }
 0x16b   : > { %1165 = vmatpush.bf16.msra.mxu0 %v1911_v42  ;;  %v2859_v17 = vld [vmem:[%s2699_s17] sm:$0xff]  ;;  %v2122_v21 = vld [vmem:[%s2681_s15 + $0x4] sm:$0xf]  ;;  %v1876_v23 = vld [vmem:[%s2681_s15 + $0xc] sm:$0xf0]  ;;  %v2059_v26 = vor.u32 %v2167_v14, %v2056_v15 }
 0x16c   : > { %1368 = vmatpush.bf16.msra.mxu3 %v2007_v45  ;;  %v2164_v27 = vld [vmem:[%s2688_s21 + $0x94] sm:$0xf]  ;;  %v2062_v28 = vld [vmem:[%s2688_s21 + $0xb0] sm:$0xf]  ;;  %v2169_v29 = vld [vmem:[%s2688_s21 + $0xb8] sm:$0xf0]  ;;  %v1879_v33 = vor.u32 %v2122_v21, %v1876_v23  ;;  %v2876_v35 = vpack.c.bf16 %v2862_v19, %v2859_v17 }
 0x16d   : > { %v2044_v30 = vld [vmem:[%s2688_s21 + $0x9c] sm:$0xf0]  ;;  %v1918_v31 = vld [vmem:[%s2681_s15 + $0x50] sm:$0xf]  ;;  %v2133_v32 = vld [vmem:[%s2681_s15 + $0x58] sm:$0xf0]  ;;  %v2063_v37 = vor.u32 %v2169_v29, %v2062_v28 }
 0x16e   : > { %1179 = vmatpush.bf16.msra.mxu1 %v1915_v52  ;;  %1191 = vmatpush.bf16.msra.mxu2 %v1943_v8  ;;  %v2872_v34 = vld [vmem:[#allocation2] sm:$0xff]  ;;  %v2047_v38 = vor.u32 %v2164_v27, %v2044_v30  ;;  %v2166_v41 = vld [vmem:[%s2688_s21 + $0xa0] sm:$0xf0]  ;;  %v1919_v42 = vor.u32 %v2133_v32, %v1918_v31  ;;  %v2032_v36 = vld [vmem:[%s2688_s21 + $0x84] sm:$0xf0]  ;;  %v1021_v27 = vperm.slane %v2712_v0, 0 }
 0x16f   : > { %1166 = vmatpush.bf16.msra.mxu0 %v1899_v54  ;;  %v2161_v39 = vld [vmem:[%s2688_s21 + $0x7c] sm:$0xf]  ;;  %v2050_v40 = vld [vmem:[%s2688_s21 + $0x98] sm:$0xf]  ;;  %v2130_v44 = vld [vmem:[%s2681_s15 + $0x40] sm:$0xf0] }
 0x170   : > { %1369 = vmatpush.bf16.msra.mxu3 %v1995_v57  ;;  %v1906_v43 = vld [vmem:[%s2681_s15 + $0x38] sm:$0xf]  ;;  %v2051_v45 = vor.u32 %v2166_v41, %v2050_v40  ;;  %v2035_v46 = vor.u32 %v2161_v39, %v2032_v36  ;;  %v2158_v47 = vld [vmem:[%s2688_s21 + $0x64] sm:$0xf]  ;;  %v2038_v48 = vld [vmem:[%s2688_s21 + $0x80] sm:$0xf] }
 0x171   : > { %v2163_v49 = vld [vmem:[%s2688_s21 + $0x88] sm:$0xf0]  ;;  %v1907_v50 = vor.u32 %v2130_v44, %v1906_v43  ;;  %v2020_v51 = vld [vmem:[%s2688_s21 + $0x6c] sm:$0xf0]  ;;  %v1894_v52 = vld [vmem:[%s2681_s15 + $0x20] sm:$0xf] }
 0x172   : > { %1180 = vmatpush.bf16.msra.mxu1 %v1903_v2  ;;  %1192 = vmatpush.bf16.msra.mxu2 %v1931_v24  ;;  %v2127_v53 = vld [vmem:[%s2681_s15 + $0x28] sm:$0xf0]  ;;  %v2039_v54 = vor.u32 %v2163_v49, %v2038_v48  ;;  %v2023_v55 = vor.u32 %v2158_v47, %v2020_v51  ;;  %v2026_v56 = vld [vmem:[%s2688_s21 + $0x68] sm:$0xf]  ;;  %v2160_v57 = vld [vmem:[%s2688_s21 + $0x70] sm:$0xf0] }
 0x173   : > { %1167 = vmatpush.bf16.msra.mxu0 %v1887_v4  ;;  %v2155_v20 = vld [vmem:[%s2688_s21 + $0x4c] sm:$0xf]  ;;  %v1895_v58 = vor.u32 %v2127_v53, %v1894_v52  ;;  %v2008_v59 = vld [vmem:[%s2688_s21 + $0x54] sm:$0xf0]  ;;  %v1882_v60 = vld [vmem:[%s2681_s15 + $0x8] sm:$0xf]  ;;  %v2027_v22 = vor.u32 %v2160_v57, %v2026_v56 }
 0x174   : > { %1370 = vmatpush.bf16.msra.mxu3 %v1983_v9  ;;  %v2124_v61 = vld [vmem:[%s2681_s15 + $0x10] sm:$0xf0]  ;;  %v2011_v62 = vor.u32 %v2155_v20, %v2008_v59  ;;  %v2014_v63 = vld [vmem:[%s2688_s21 + $0x50] sm:$0xf]  ;;  %v2157_v2 = vld [vmem:[%s2688_s21 + $0x58] sm:$0xf0] }
 0x175   : > { %v1883_v3 = vor.u32 %v2124_v61, %v1882_v60  ;;  %v2152_v4 = vld [vmem:[%s2688_s21 + $0x34] sm:$0xf]  ;;  %v1996_v5 = vld [vmem:[%s2688_s21 + $0x3c] sm:$0xf0]  ;;  %v2015_v6 = vor.u32 %v2157_v2, %v2014_v63  ;;  %v2002_v8 = vld [vmem:[%s2688_s21 + $0x38] sm:$0xf] }
 0x176   : > { %1181 = vmatpush.bf16.msra.mxu1 %v1891_v16  ;;  %1193 = vmatpush.bf16.msra.mxu2 %v1919_v42  ;;  %v1999_v7 = vor.u32 %v2152_v4, %v1996_v5  ;;  %v2154_v9 = vld [vmem:[%s2688_s21 + $0x40] sm:$0xf0]  ;;  %v2149_v10 = vld [vmem:[%s2688_s21 + $0x1c] sm:$0xf]  ;;  %v1984_v11 = vld [vmem:[%s2688_s21 + $0x24] sm:$0xf0] }
 0x177   : > { %1168 = vmatpush.bf16.msra.mxu0 %v1875_v18  ;;  %v2003_v12 = vor.u32 %v2154_v9, %v2002_v8  ;;  %v1987_v13 = vor.u32 %v2149_v10, %v1984_v11  ;;  %v1990_v14 = vld [vmem:[%s2688_s21 + $0x20] sm:$0xf]  ;;  %v2151_v15 = vld [vmem:[%s2688_s21 + $0x28] sm:$0xf0]  ;;  %v2146_v16 = vld [vmem:[%s2688_s21 + $0x4] sm:$0xf] }
 0x178   : > { %1371 = vmatpush.bf16.msra.mxu3 %v1971_v25  ;;  %v1972_v18 = vld [vmem:[%s2688_s21 + $0xc] sm:$0xf0]  ;;  %v1991_v21 = vor.u32 %v2151_v15, %v1990_v14  ;;  %v1978_v24 = vld [vmem:[%s2688_s21 + $0x8] sm:$0xf]  ;;  %v2148_v25 = vld [vmem:[%s2688_s21 + $0x10] sm:$0xf0] }
 0x179   : > { %v1975_v23 = vor.u32 %v2146_v16, %v1972_v18  ;;  %v1487_v60 = vperm.slane %v2714_v1, 0  ;;  %v1023_v5 = vperm.slane %v2712_v0, 2  ;;  %s2981_s21 = sld [smem:[#allocation16_spill]] }
 0x17a   : > { %1182 = vmatpush.bf16.msra.mxu1 %v1879_v33  ;;  %1169 = vmatmul.bf16.vlgmr.msra.gmra.mxu0 %v2872_v34 }
 0x17b   : > { %1378 = vmatpush.bf16.msrb.mxu0 %v2059_v26  ;;  %1372 = vmatmul.bf16.vlgmr.msra.gmra.mxu3 %v2876_v35  ;;  %v1979_v26 = vor.u32 %v2148_v25, %v1978_v24 }
 0x17c   : > { %1194 = vmatpush.bf16.msra.mxu2 %v1907_v50 }
 0x17d   : > { %1183 = vmatmul.bf16.vlgmr.msra.gmra.mxu1 %v2872_v34 }
 0x17e   : > { %1392 = vmatpush.bf16.msrb.mxu1 %v2063_v37 }
 0x17f   : > { %1379 = vmatpush.bf16.msrb.mxu0 %v2047_v38 }
 0x180   : > { %1195 = vmatpush.bf16.msra.mxu2 %v1895_v58 }
 0x182   : > { %1393 = vmatpush.bf16.msrb.mxu1 %v2051_v45 }
 0x183   : > { %1380 = vmatpush.bf16.msrb.mxu0 %v2035_v46 }
 0x184   : > { %1196 = vmatpush.bf16.msra.mxu2 %v1883_v3 }
 0x186   : > { %1394 = vmatpush.bf16.msrb.mxu1 %v2039_v54 }
 0x187   : > { %1381 = vmatpush.bf16.msrb.mxu0 %v2023_v55  ;;  %1197 = vmatmul.bf16.vlgmr.msra.gmra.mxu2 %v2872_v34 }
 0x18a   : > { %1395 = vmatpush.bf16.msrb.mxu1 %v2027_v22 }
 0x18b   : > { %1382 = vmatpush.bf16.msrb.mxu0 %v2011_v62 }
 0x18e   : > { %1396 = vmatpush.bf16.msrb.mxu1 %v2015_v6 }
 0x18f   : > { %1383 = vmatpush.bf16.msrb.mxu0 %v1999_v7 }
 0x192   : > { %1397 = vmatpush.bf16.msrb.mxu1 %v2003_v12 }
 0x193   : > { %1384 = vmatpush.bf16.msrb.mxu0 %v1987_v13 }
 0x196   : > { %1398 = vmatpush.bf16.msrb.mxu1 %v1991_v21 }
 0x197   : > { %1385 = vmatpush.bf16.msrb.mxu0 %v1975_v23 }
 0x19a   : > { %1386 = vmatmul.bf16.vlgmr.msrb.gmra.mxu0 %v2876_v35  ;;  %1399 = vmatpush.bf16.msrb.mxu1 %v1979_v26 }
 0x19d   : > { %1400 = vmatmul.bf16.vlgmr.msrb.gmra.mxu1 %v2876_v35  ;;  %v1022_v35 = vperm.slane %v2712_v0, 1 }
 0x1f7   : > { %v1170_v28 = vpop.f32.mrf.mxu0 }
 0x1f8   : > { %v1171_v29 = vadd.f32 %v1170_v28, %v1021_v27 }
 0x1fa   : > { %v1184_v42 = vpop.f32.mrf.mxu1 }
 0x1fb   : > { %v1185_v43 = vadd.f32 %v1184_v42, %v1022_v35 }
 0x1fe   : > { %v1373_v30 = vpop.f32.mrf.mxu3 }
 0x1ff   : > { %v1406_v31 = vadd.f32 %v1373_v30, %v1171_v29  ;;  %v1172_v32 = vpop.f32.mrf.mxu0 }
 0x200   : > { %v1173_v34 = vadd.f32 %v1172_v32, %v1021_v27 }
 0x201   : > { %v2064_v33 = vmul.f32 -1.442695, %v1406_v31 }
 0x202   : > { %v1186_v48 = vpop.f32.mrf.mxu1 }
 0x203   : > { %2288 = vpow2.f32 %v2064_v33  ;;  %v1187_v54 = vadd.f32 %v1186_v48, %v1022_v35 }
 0x206   : > { %v1375_v37 = vpop.f32.mrf.mxu3 }
 0x207   : > { %v1407_v38 = vadd.f32 %v1375_v37, %v1173_v34 }
 0x209   : > { %v2289_v39 = vpop.eup %2288  ;;  %v2065_v40 = vmul.f32 -1.442695, %v1407_v38 }
 0x20a   : > { %v1414_v41 = vadd.f32 1.0, %v2289_v39  ;;  %v1198_v9 = vpop.f32.mrf.mxu2 }
 0x20b   : > { %2290 = vpow2.f32 %v2065_v40  ;;  %v1199_v11 = vadd.f32 %v1198_v9, %v1023_v5 }
 0x20c   : > { %2292 = vrcp.f32 %v1414_v41  ;;  %vm1421_vm0 = vweird.f32 %v1414_v41  ;;  %v1427_v57 = vand.u32 2147483648, %v1414_v41  ;;  %v1425_v59 = vand.u32 2147483647, %v1414_v41 }
 0x20e   : > { %v1428_v4 = vor.u32 1.1754944e-38, %v1427_v57  ;;  %vm1426_vm3 = vcmp.eq.f32.partialorder %v1425_v59, 8.507059e+37 }
 0x211   : > { %v2291_v36 = vpop.eup %2290 }
 0x212   : > { %v2293_v44 = vpop.eup %2292  ;;  %v1415_v45 = vadd.f32 1.0, %v2291_v36  ;;  %v1200_v31 = vpop.f32.mrf.mxu2 }
 0x213   : > { %v1417_v46 = vmul.f32 %v2293_v44, %v1414_v41  ;;  %vm1422_vm1 = vweird.f32 %v2293_v44  ;;  %v1201_v37 = vadd.f32 %v1200_v31, %v1023_v5 }
 0x214   : > { %2294 = vrcp.f32 %v1415_v45  ;;  %vm1423_vm2 = vmor %vm1421_vm0, %vm1422_vm1  ;;  %v1442_v12 = vand.u32 2147483648, %v1415_v45  ;;  %vm1436_vm5 = vweird.f32 %v1415_v45  ;;  %v1440_v14 = vand.u32 2147483647, %v1415_v45 }
 0x215   : > { %v1418_v50 = vsub.f32 1.0, %v1417_v46 }
 0x216   : > { %v1443_v25 = vor.u32 1.1754944e-38, %v1442_v12  ;;  %vm1441_vm7 = vcmp.eq.f32.partialorder %v1440_v14, 8.507059e+37 }
 0x217   : > { %v1387_v47 = vpop.f32.mrf.mxu0  ;;  %v1419_v52 = vmul.f32 %v2293_v44, %v1418_v50 }
 0x218   : > { %v1446_v49 = vadd.f32 %v1387_v47, %v1185_v43 }
 0x219   : > { %v1420_v20 = vadd.f32 %v2293_v44, %v1419_v52 }
 0x21a   : > { %v2066_v51 = vmul.f32 -1.442695, %v1446_v49  ;;  %v2295_v53 = vpop.eup %2294  ;;  %v1401_v62 = vpop.f32.mrf.mxu1 }
 0x21b   : > { %v1432_v55 = vmul.f32 %v2295_v53, %v1415_v45  ;;  %v1424_v3 = vsel %vm1423_vm2, %v2293_v44, %v1420_v20  ;;  %v1489_v6 = vadd.f32 %v1487_v60, %v1401_v62  ;;  %vm1437_vm4 = vweird.f32 %v2295_v53 }
 0x21c   : > { %2296 = vpow2.f32 %v2066_v51  ;;  %v1429_v8 = vsel %vm1426_vm3, %v1428_v4, %v1424_v3  ;;  %vm1438_vm6 = vmor %vm1436_vm5, %vm1437_vm4 }
 0x21d   : > { %v1433_v61 = vsub.f32 1.0, %v1432_v55  ;;  %v1491_v10 = vmul.f32 %v1489_v6, %v1429_v8 }
 0x21f   : > { %v1389_v56 = vpop.f32.mrf.mxu0  ;;  %v1434_v7 = vmul.f32 %v2295_v53, %v1433_v61  ;;  %v1493_v0 = vadd.f32 %v1491_v10, %v1199_v11 }
 0x220   : > { %v1447_v58 = vadd.f32 %v1389_v56, %v1187_v54 }
 0x221   : > { %v1435_v1 = vadd.f32 %v2295_v53, %v1434_v7 }
 0x222   : > { %v2297_v22 = vpop.eup %2296  ;;  %v2067_v63 = vmul.f32 -1.442695, %v1447_v58  ;;  %v1403_v18 = vpop.f32.mrf.mxu1 }
 0x223   : > { %v1454_v2 = vadd.f32 1.0, %v2297_v22  ;;  %v1439_v23 = vsel %vm1438_vm6, %v2295_v53, %v1435_v1  ;;  %v1490_v27 = vadd.f32 %v1487_v60, %v1403_v18 }
 0x224   : > { %v1444_v30 = vsel %vm1441_vm7, %v1443_v25, %v1439_v23 }
 0x225   : > { %2298 = vrcp.f32 %v1454_v2  ;;  %v1467_v26 = vand.u32 2147483648, %v1454_v2  ;;  %v1465_v29 = vand.u32 2147483647, %v1454_v2  ;;  %vm1461_vm9 = vweird.f32 %v1454_v2 }
 0x226   : > { %2300 = vpow2.f32 %v2067_v63  ;;  %v1492_v34 = vmul.f32 %v1490_v27, %v1444_v30 }
 0x227   : > { %v1468_v33 = vor.u32 1.1754944e-38, %v1467_v26  ;;  %vm1466_vm11 = vcmp.eq.f32.partialorder %v1465_v29, 8.507059e+37 }
 0x228   : > { %v1494_v36 = vadd.f32 %v1492_v34, %v1201_v37 }
 0x22b   : > { %v2299_v13 = vpop.eup %2298 }
 0x22c   : > { %v2301_v15 = vpop.eup %2300  ;;  %v1457_v16 = vmul.f32 %v2299_v13, %v1454_v2  ;;  %vm1462_vm8 = vweird.f32 %v2299_v13 }
 0x22d   : > { %v1455_v21 = vadd.f32 1.0, %v2301_v15  ;;  %vm1463_vm10 = vmor %vm1461_vm9, %vm1462_vm8 }
 0x22e   : > { %v1458_v24 = vsub.f32 1.0, %v1457_v16 }
 0x22f   : > { %2302 = vrcp.f32 %v1455_v21  ;;  %v1482_v46 = vand.u32 2147483648, %v1455_v21  ;;  %v1480_v49 = vand.u32 2147483647, %v1455_v21  ;;  %vm1476_vm13 = vweird.f32 %v1455_v21 }
 0x230   : > { %v1459_v28 = vmul.f32 %v2299_v13, %v1458_v24  ;;  %2304 = vtanh.f32 %v1493_v0 }
 0x231   : > { %2306 = vtanh.f32 %v1494_v36  ;;  %v1483_v51 = vor.u32 1.1754944e-38, %v1482_v46  ;;  %vm1481_vm15 = vcmp.eq.f32.partialorder %v1480_v49, 8.507059e+37 }
 0x232   : > { %v1460_v32 = vadd.f32 %v2299_v13, %v1459_v28 }
 0x234   : > { %v1464_v38 = vsel %vm1463_vm10, %v2299_v13, %v1460_v32 }
 0x235   : > { %v2303_v39 = vpop.eup %2302  ;;  %v1469_v40 = vsel %vm1466_vm11, %v1468_v33, %v1464_v38 }
 0x236   : > { %v1497_v41 = vsub.f32 1.0, %v1469_v40  ;;  %v1472_v42 = vmul.f32 %v2303_v39, %v1455_v21  ;;  %v2305_v35 = vpop.eup %2304  ;;  %v1501_v44 = vmul.f32 %v1469_v40, %v2859_v17  ;;  %vm1477_vm12 = vweird.f32 %v2303_v39 }
 0x237   : > { %vm1478_vm14 = vmor %vm1476_vm13, %vm1477_vm12  ;;  %v2307_v54 = vpop.eup %2306 }
 0x238   : > { %v1499_v43 = vmul.f32 %v2305_v35, %v1497_v41  ;;  %v1473_v45 = vsub.f32 1.0, %v1472_v42 }
 0x23a   : > { %v1503_v47 = vadd.f32 %v1501_v44, %v1499_v43  ;;  %v1474_v48 = vmul.f32 %v2303_v39, %v1473_v45 }
 0x23c   : > { %1509 = vst [vmem:[%s2981_s21] sm:$0xff] %v1503_v47  ;;  %v1475_v50 = vadd.f32 %v2303_v39, %v1474_v48 }
 0x23d   : > { %1511 = vst [vmem:[%s2710_s25] sm:$0xff] %v1503_v47 }
 0x23e   : > { %v1479_v52 = vsel %vm1478_vm14, %v2303_v39, %v1475_v50 }
 0x23f   : > { %v1484_v17 = vsel %vm1481_vm15, %v1483_v51, %v1479_v52 }
 0x240   : > { %v1498_v53 = vsub.f32 1.0, %v1484_v17  ;;  %v1502_v20 = vmul.f32 %v1484_v17, %v2862_v19 }
 0x242   : > { %v1500_v55 = vmul.f32 %v2307_v54, %v1498_v53 }
 0x244   : > { %v1504_v56 = vadd.f32 %v1502_v20, %v1500_v55 }
 0x246   : > { %v2178_v57 = vpack.c.bf16 %v1504_v56, %v1503_v47  ;;  %1510 = vst [vmem:[%s2981_s21 + $0x8] sm:$0xff] %v1504_v56 }
 0x247   : > { %1512 = vst [vmem:[%s2710_s25 + $0x8] sm:$0xff] %v1504_v56 }
 0x248   : > { %2179 = vst [vmem:[#allocation2] sm:$0xff] %v2178_v57  }
 0x249 PF: > { %s2982_s11 = sld [smem:[#allocation12_spill]]  ;;  %s2985_s27 = smov %s2444_s28 }
 0x24a   : > { %s2983_s18 = sld [smem:[#allocation11_spill]]  ;;  %s2986_s28 = smov %s2448_s29 }
 0x24b   : > { %s2984_s10 = sld [smem:[#allocation13_spill]]  ;;  %s2987_s29 = smov %s2645_s16 }
 0x24c   : > { %s2988_s30 = smov %s2456_s9 }
 0x24f   : > { %p20_p1 = scmp.ge.s32.totalorder %s2982_s11, 5  }
 0x250   : > { %s2989_s9 = smov %s2983_s18 }
 0x251   :  { %22 = sbr.rel (!%p20_p1) target bundleno = 10 (0xa), region = 129 }
 0x256   :  { %1540 = vsyncpa [#allocation4], 1 }
 0x257   :  { %1542 = vsyncpa [#allocation4 + $0x1], 1 }
 0x258   :  { %1543 = vsyncpa [#allocation6], 1 }
 0x259   :  { %1545 = vsyncpa [#allocation6 + $0x1], 1 }

</bundles_post_ra>
